<compile_context>
chip_gen: v7x
topology: tpu7x:2x2x1
jax: 0.10.0
libtpu: 0.0.40
codegen_flags: <defaults>
</compile_context>

<pallas_src>
import math

import numpy as np

import jax
import jax.numpy as jnp
from jax.experimental import pallas as pl
from jax.experimental.pallas import tpu as pltpu


# ---------------------------------------------------------------------------
# Pallas kernel: fused (depthwise 3x3 + block-diag pointwise 1x1) + row-tiled attention
# ---------------------------------------------------------------------------
def _make_cfc_kernel(H, W, C, h_tile, mxu_dtype):
    HW = H * W
    T = h_tile
    TW = T * W
    C3 = 3 * C
    f32 = jnp.float32

    def kernel(hs_ref, cx_ref, dww_ref, pwblk_ref, pwb_ref, mask_ref,
               out_ref, qkv_ref):
        # hs_ref / cx_ref : (1, C, HW)   channel-major, spatial flattened into lanes
        # dww_ref         : (9, 3C, 1)   stacked depthwise taps [w_q | w_k | w_v] per tap
        # pwblk_ref       : (3C, 3C)     block-diagonal pointwise weight (q block pre-scaled)
        # pwb_ref         : (3C, 1)      effective bias (depthwise bias folded through)
        # mask_ref        : (9, 1, HW)   0/1 validity mask per 3x3 tap (zero padding)
        # out_ref         : (1, C, T*W)  lane-dense output row-tile
        # qkv_ref         : (3C, HW)     persistent per-batch q/k/v scratch (mxu_dtype)
        ht = pl.program_id(1)

        # ---- once per batch (ht == 0): depthwise 3x3 + fused pointwise 1x1 ----
        @pl.when(ht == 0)
        def _():
            hs = hs_ref[0].astype(f32)                         # (C, HW)
            cx = cx_ref[0].astype(f32)
            # stacked depthwise input: q uses hs, k uses ctx, v uses hs
            stacked = jnp.concatenate([hs, cx, hs], axis=0)    # (3C, HW)
            acc = None
            for dh in range(3):
                for dw in range(3):
                    t = dh * 3 + dw
                    s = (dh - 1) * W + (dw - 1)    # flat-lane offset of this tap
                    w_t = dww_ref[t].astype(f32)   # (3C, 1), one broadcast per tap
                    if s == 0:                     # center tap: no shift, no halo mask
                        tap = stacked
                    else:                          # lane rotation (XLU) + edge mask
                        tap = pltpu.roll(stacked, (-s) % HW, 1) * mask_ref[t]
                    contrib = tap * w_t
                    acc = contrib if acc is None else acc + contrib
            # fused pointwise: block-diag (3C,3C) @ (3C,HW) on the MXU, bf16 in / f32 acc
            qkv = jnp.dot(pwblk_ref[...].astype(mxu_dtype),
                          acc.astype(mxu_dtype),
                          preferred_element_type=f32) + pwb_ref[...].astype(f32)
            qkv_ref[...] = qkv.astype(qkv_ref.dtype)

        # ---- per row-tile channel attention (rows are independent) ----
        start = ht * TW
        if TW % 128 == 0:
            start = pl.multiple_of(start, 128)
        slab = qkv_ref[:, pl.ds(start, TW)]                    # (3C, T*W)

        # one batched relayout for q/k/v instead of three
        xh = slab.reshape(C3, T, W).transpose(1, 0, 2)         # (T, 3C, W)
        qh = xh[:, 0:C, :]                                     # (T, C, W)
        kh = xh[:, C:2 * C, :]
        vh = xh[:, 2 * C:, :]

        # scores: 1/sqrt(head_size) already folded into the query block weights/bias
        sc = jnp.einsum('tcw,tdw->tcd', qh, kh,
                        preferred_element_type=f32)            # (T, C, C)
        sc = sc - jnp.max(sc, axis=-1, keepdims=True)
        p = jnp.exp(sc)
        p = p * pl.reciprocal(jnp.sum(p, axis=-1, keepdims=True), approx=True)
        o = jnp.einsum('tcd,tdw->tcw', p.astype(mxu_dtype), vh,
                       preferred_element_type=f32)             # (T, C, W)

        # back to channel-major (C, T*W): full-lane (unmasked) store
        o = o.transpose(1, 0, 2).reshape(C, TW)
        out_ref[0] = o.astype(out_ref.dtype)

    return kernel


# ---------------------------------------------------------------------------
# Hoisted, call-invariant precompute (parameter re-layout + halo masks)
# ---------------------------------------------------------------------------
def prepare_cfc_params(params, num_heads):
    """Re-layout PyTorch conv params once (outside the per-call path)."""
    names = ('q', 'k', 'v')
    C = params['q']['dw_b'].shape[0]
    head = C // num_heads
    scale = 1.0 / math.sqrt(head)

    # depthwise taps stacked along channels (q|k|v), laid out per tap: (9, 3C, 1)
    dw = jnp.concatenate([params[n]['dw_w'].reshape(C, 9) for n in names], axis=0)
    dww = jnp.transpose(dw, (1, 0))[:, :, None]                        # (9, 3C, 1)

    # block-diagonal fused pointwise weight; query block pre-scaled by 1/sqrt(head)
    pw = [params[n]['pw_w'].reshape(C, C) for n in names]
    pw[0] = pw[0] * scale
    pw_blk = jnp.zeros((3 * C, 3 * C), jnp.float32)
    for i in range(3):
        pw_blk = pw_blk.at[i * C:(i + 1) * C, i * C:(i + 1) * C].set(pw[i])

    # fold depthwise bias through the 1x1 conv:  W_pw @ (x + b_dw) + b_pw
    pwb = [params[n]['pw_w'].reshape(C, C) @ params[n]['dw_b'] + params[n]['pw_b']
           for n in names]
    pwb[0] = pwb[0] * scale
    pwb = jnp.concatenate(pwb, axis=0)[:, None]                        # (3C, 1)
    return dww, pw_blk, pwb


def make_tap_masks(H, W):
    """(9, 1, H*W) 0/1 validity mask per 3x3 tap (zero padding of the depthwise conv)."""
    h = np.arange(H)[:, None]
    w = np.arange(W)[None, :]
    ms = []
    for dh in range(3):
        for dw in range(3):
            ok = ((h + dh - 1 >= 0) & (h + dh - 1 < H) &
                  (w + dw - 1 >= 0) & (w + dw - 1 < W))
            ms.append(ok.reshape(1, H * W))
    return jnp.asarray(np.stack(ms).astype(np.float32))


# ---------------------------------------------------------------------------
# Row-tile selection (lane-dense output block, bounded score VMEM for v7x)
# ---------------------------------------------------------------------------
def _choose_h_tile(H, W, C, score_budget_bytes=8 << 20):
    for t in range(H, 0, -1):
        if H % t:
            continue
        if (t * W) % 128:                # output block must stay lane-dense
            continue
        if t * C * C * 4 > score_budget_bytes:
            continue
        return t
    return H                             # single full-H tile (full-extent block is legal)


# ---------------------------------------------------------------------------
# Wrapper
# ---------------------------------------------------------------------------
def cfc_forward(hidden_states, ctx, prepared_params, tap_masks, h_tile=None,
                mxu_dtype=jnp.bfloat16):
    """hidden_states, ctx: (B, C, H, W) float32, PyTorch NCHW layout."""
    B, C, H, W = hidden_states.shape
    HW = H * W
    dww, pw_blk, pwb = prepared_params

    if h_tile is None:
        h_tile = _choose_h_tile(H, W, C)
    assert H % h_tile == 0, (H, h_tile)
    n_ht = H // h_tile
    assert n_ht == 1 or (h_tile * W) % 128 == 0, "row-tile output block must be lane-dense"

    hs_flat = hidden_states.reshape(B, C, HW)   # free reshape of contiguous NCHW
    cx_flat = ctx.reshape(B, C, HW)

    kernel = _make_cfc_kernel(H, W, C, h_tile, mxu_dtype)
    out_flat = pl.pallas_call(
        kernel,
        out_shape=jax.ShapeDtypeStruct((B, C, HW), hidden_states.dtype),
        grid_spec=pltpu.PrefetchScalarGridSpec(
            num_scalar_prefetch=0,
            grid=(B, n_ht),
            in_specs=[
                pl.BlockSpec((1, C, HW), lambda b, t: (b, 0, 0)),
                pl.BlockSpec((1, C, HW), lambda b, t: (b, 0, 0)),
                pl.BlockSpec((9, 3 * C, 1), lambda b, t: (0, 0, 0)),
                pl.BlockSpec((3 * C, 3 * C), lambda b, t: (0, 0)),
                pl.BlockSpec((3 * C, 1), lambda b, t: (0, 0)),
                pl.BlockSpec((9, 1, HW), lambda b, t: (0, 0, 0)),
            ],
            out_specs=pl.BlockSpec((1, C, h_tile * W), lambda b, t: (b, 0, t)),
            scratch_shapes=[pltpu.VMEM((3 * C, HW), mxu_dtype)],
        ),
        compiler_params=pltpu.CompilerParams(
            # ht axis must stay "arbitrary": later row-tiles reuse the per-core q/k/v
            # scratch written at ht == 0 (see TODO at top of file).
            dimension_semantics=("parallel", "arbitrary"),
            vmem_limit_bytes=48 * 1024 * 1024,
        ),
    )(hs_flat, cx_flat, dww, pw_blk, pwb, tap_masks)

    # lane-dense kernel output; only a metadata reshape back to (B, C, H, W)
    return out_flat.reshape(B, C, H, W)


# ---------------------------------------------------------------------------
# Deterministic parameter init (PyTorch Conv2d weight shapes)
# ---------------------------------------------------------------------------
def init_depth_conv_params(key, in_ch, out_ch):
    k1, k2, k3, k4 = jax.random.split(key, 4)
    b_dw = 1.0 / math.sqrt(1 * 3 * 3)
    b_pw = 1.0 / math.sqrt(in_ch)
    return {
        'dw_w': jax.random.uniform(k1, (in_ch, 1, 3, 3), jnp.float32, -b_dw, b_dw),
        'dw_b': jax.random.uniform(k2, (in_ch,), jnp.float32, -b_dw, b_dw),
        'pw_w': jax.random.uniform(k3, (out_ch, in_ch, 1, 1), jnp.float32, -b_pw, b_pw),
        'pw_b': jax.random.uniform(k4, (out_ch,), jnp.float32, -b_pw, b_pw),
    }


# ---------------------------------------------------------------------------
# Pure-JAX reference (mirrors the PyTorch forward) for verification
# ---------------------------------------------------------------------------
def _depth_conv_ref(x, p):
    C = x.shape[1]
    y = jax.lax.conv_general_dilated(
        x, p['dw_w'], window_strides=(1, 1), padding='SAME',
        dimension_numbers=('NCHW', 'OIHW', 'NCHW'), feature_group_count=C)
    y = y + p['dw_b'][None, :, None, None]
    z = jax.lax.conv_general_dilated(
        y, p['pw_w'], window_strides=(1, 1), padding='VALID',
        dimension_numbers=('NCHW', 'OIHW', 'NCHW'))
    return z + p['pw_b'][None, :, None, None]


def cfc_ref(hs, cx, params, num_heads):
    C = hs.shape[1]
    head = C // num_heads
    q = _depth_conv_ref(hs, params['q']).transpose(0, 2, 1, 3)   # (B, H, C, W)
    k = _depth_conv_ref(cx, params['k']).transpose(0, 2, 1, 3)
    v = _depth_conv_ref(hs, params['v']).transpose(0, 2, 1, 3)
    s = jnp.matmul(q, jnp.swapaxes(k, -1, -2)) / math.sqrt(head)
    p = jax.nn.softmax(s, axis=-1)
    o = jnp.matmul(p, v)                                          # (B, H, C, W)
    return o.transpose(0, 2, 1, 3)                                # (B, C, H, W)


if __name__ == "__main__":
    B, dim, H, W = 2, 8, 16, 16
    num_heads = 4

    key = jax.random.PRNGKey(0)
    k_hs, k_cx, k_q, k_k, k_v = jax.random.split(key, 5)
    hidden_states = jax.random.normal(k_hs, (B, dim, H, W), jnp.float32)
    ctx = jax.random.normal(k_cx, (B, dim, H, W), jnp.float32)
    params = {
        'q': init_depth_conv_params(k_q, dim, dim),
        'k': init_depth_conv_params(k_k, dim, dim),
        'v': init_depth_conv_params(k_v, dim, dim),
    }

    prepared = prepare_cfc_params(params, num_heads)   # hoisted (once per model)
    masks = make_tap_masks(H, W)                       # hoisted (once per shape)

    ref = cfc_ref(hidden_states, ctx, params, num_heads)

    # Check both the multi-row-tile path (h_tile=8 -> 2 tiles, scratch reused across
    # grid steps) and the auto-selected single-tile path.
    for ht_arg in (8, None):
        out = cfc_forward(hidden_states, ctx, prepared, masks, h_tile=ht_arg)
        out = jax.block_until_ready(out)
        assert out.shape == (B, dim, H, W), out.shape
        err = float(jnp.max(jnp.abs(out - ref)))
        # Tolerance loosened vs. pure f32: MXU operands (fused pointwise matmul and
        # both attention einsums) are bf16 with f32 accumulation, and the softmax
        # denominator uses the EUP approximate reciprocal.  Any real layout/indexing
        # bug produces O(1) errors and is still caught here.
        assert err < 5e-2, f"h_tile={ht_arg}: max abs err {err}"

    print("KERNEL_OK")
</pallas_src>

<mosaic_0001>
module attributes {stable_mosaic.version = 11 : i64} {
  func.func @kernel(%arg0: i32, %arg1: i32, %arg2: memref<1x8x256xf32, #tpu.memory_space<vmem>>, %arg3: memref<1x8x256xf32, #tpu.memory_space<vmem>>, %arg4: memref<9x24x1xf32, #tpu.memory_space<vmem>>, %arg5: memref<24x24xf32, #tpu.memory_space<vmem>>, %arg6: memref<24x1xf32, #tpu.memory_space<vmem>>, %arg7: memref<9x1x256xf32, #tpu.memory_space<vmem>>, %arg8: memref<1x8x128xf32, #tpu.memory_space<vmem>>, %arg9: memref<24x256xbf16, #tpu.memory_space<vmem>>) attributes {dimension_semantics = [#tpu.dimension_semantics<parallel>, #tpu.dimension_semantics<arbitrary>], iteration_bounds = array<i64: 2, 2>, scalar_prefetch = 0 : i64, scratch_operands = 1 : i64, tpu.core_type = #tpu.core_type<tc>, window_params = [{transform_indices = @transform_0, window_bounds = array<i64: 1, 8, 256>}, {transform_indices = @transform_1, window_bounds = array<i64: 1, 8, 256>}, {pipeline_mode = #tpu.pipeline_mode<synchronous>, transform_indices = @transform_2, window_bounds = array<i64: 9, 24, 1>}, {pipeline_mode = #tpu.pipeline_mode<synchronous>, transform_indices = @transform_3, window_bounds = array<i64: 24, 24>}, {pipeline_mode = #tpu.pipeline_mode<synchronous>, transform_indices = @transform_4, window_bounds = array<i64: 24, 1>}, {pipeline_mode = #tpu.pipeline_mode<synchronous>, transform_indices = @transform_5, window_bounds = array<i64: 9, 1, 256>}, {transform_indices = @transform_6, window_bounds = array<i64: 1, 8, 128>}]} {
    %c0_i32 = arith.constant 0 : i32
    %0 = arith.cmpi eq, %arg1, %c0_i32 : i32
    %1 = arith.extui %0 : i1 to i32
    %c0_i32_0 = arith.constant 0 : i32
    %2 = arith.cmpi ne, %1, %c0_i32_0 : i32
    scf.if %2 {
      %c0_7 = arith.constant 0 : index
      %c0_8 = arith.constant 0 : index
      %c0_9 = arith.constant 0 : index
      %30 = vector.load %arg2[%c0_7, %c0_8, %c0_9] : memref<1x8x256xf32, #tpu.memory_space<vmem>>, vector<1x8x256xf32>
      %31 = vector.shape_cast %30 : vector<1x8x256xf32> to vector<8x256xf32>
      %c0_10 = arith.constant 0 : index
      %c0_11 = arith.constant 0 : index
      %c0_12 = arith.constant 0 : index
      %32 = vector.load %arg3[%c0_10, %c0_11, %c0_12] : memref<1x8x256xf32, #tpu.memory_space<vmem>>, vector<1x8x256xf32>
      %33 = vector.shape_cast %32 : vector<1x8x256xf32> to vector<8x256xf32>
      %34 = tpu.concatenate %31, %33, %31 in 0 : vector<8x256xf32>, vector<8x256xf32>, vector<8x256xf32> -> vector<24x256xf32>
      %c0_13 = arith.constant 0 : index
      %c0_14 = arith.constant 0 : index
      %c0_15 = arith.constant 0 : index
      %35 = vector.load %arg4[%c0_13, %c0_14, %c0_15] : memref<9x24x1xf32, #tpu.memory_space<vmem>>, vector<1x24x1xf32>
      %36 = vector.shape_cast %35 : vector<1x24x1xf32> to vector<24x1xf32>
      %c17_i32 = arith.constant 17 : i32
      %37 = tpu.dynamic_rotate %34 by %c17_i32 dim 1 : vector<24x256xf32>, i32 -> vector<24x256xf32>
      %c0_16 = arith.constant 0 : index
      %c0_17 = arith.constant 0 : index
      %c0_18 = arith.constant 0 : index
      %38 = vector.load %arg7[%c0_16, %c0_17, %c0_18] : memref<9x1x256xf32, #tpu.memory_space<vmem>>, vector<1x1x256xf32>
      %39 = vector.shape_cast %38 : vector<1x1x256xf32> to vector<1x256xf32>
      %40 = vector.broadcast %39 : vector<1x256xf32> to vector<24x256xf32>
      %41 = arith.mulf %37, %40 : vector<24x256xf32>
      %42 = vector.broadcast %36 : vector<24x1xf32> to vector<24x256xf32>
      %43 = arith.mulf %41, %42 : vector<24x256xf32>
      %c1 = arith.constant 1 : index
      %c0_19 = arith.constant 0 : index
      %c0_20 = arith.constant 0 : index
      %44 = vector.load %arg4[%c1, %c0_19, %c0_20] : memref<9x24x1xf32, #tpu.memory_space<vmem>>, vector<1x24x1xf32>
      %45 = vector.shape_cast %44 : vector<1x24x1xf32> to vector<24x1xf32>
      %c16_i32 = arith.constant 16 : i32
      %46 = tpu.dynamic_rotate %34 by %c16_i32 dim 1 : vector<24x256xf32>, i32 -> vector<24x256xf32>
      %c1_21 = arith.constant 1 : index
      %c0_22 = arith.constant 0 : index
      %c0_23 = arith.constant 0 : index
      %47 = vector.load %arg7[%c1_21, %c0_22, %c0_23] : memref<9x1x256xf32, #tpu.memory_space<vmem>>, vector<1x1x256xf32>
      %48 = vector.shape_cast %47 : vector<1x1x256xf32> to vector<1x256xf32>
      %49 = vector.broadcast %48 : vector<1x256xf32> to vector<24x256xf32>
      %50 = arith.mulf %46, %49 : vector<24x256xf32>
      %51 = vector.broadcast %45 : vector<24x1xf32> to vector<24x256xf32>
      %52 = arith.mulf %50, %51 : vector<24x256xf32>
      %53 = arith.addf %43, %52 : vector<24x256xf32>
      %c2 = arith.constant 2 : index
      %c0_24 = arith.constant 0 : index
      %c0_25 = arith.constant 0 : index
      %54 = vector.load %arg4[%c2, %c0_24, %c0_25] : memref<9x24x1xf32, #tpu.memory_space<vmem>>, vector<1x24x1xf32>
      %55 = vector.shape_cast %54 : vector<1x24x1xf32> to vector<24x1xf32>
      %c15_i32 = arith.constant 15 : i32
      %56 = tpu.dynamic_rotate %34 by %c15_i32 dim 1 : vector<24x256xf32>, i32 -> vector<24x256xf32>
      %c2_26 = arith.constant 2 : index
      %c0_27 = arith.constant 0 : index
      %c0_28 = arith.constant 0 : index
      %57 = vector.load %arg7[%c2_26, %c0_27, %c0_28] : memref<9x1x256xf32, #tpu.memory_space<vmem>>, vector<1x1x256xf32>
      %58 = vector.shape_cast %57 : vector<1x1x256xf32> to vector<1x256xf32>
      %59 = vector.broadcast %58 : vector<1x256xf32> to vector<24x256xf32>
      %60 = arith.mulf %56, %59 : vector<24x256xf32>
      %61 = vector.broadcast %55 : vector<24x1xf32> to vector<24x256xf32>
      %62 = arith.mulf %60, %61 : vector<24x256xf32>
      %63 = arith.addf %53, %62 : vector<24x256xf32>
      %c3 = arith.constant 3 : index
      %c0_29 = arith.constant 0 : index
      %c0_30 = arith.constant 0 : index
      %64 = vector.load %arg4[%c3, %c0_29, %c0_30] : memref<9x24x1xf32, #tpu.memory_space<vmem>>, vector<1x24x1xf32>
      %65 = vector.shape_cast %64 : vector<1x24x1xf32> to vector<24x1xf32>
      %c1_i32 = arith.constant 1 : i32
      %66 = tpu.dynamic_rotate %34 by %c1_i32 dim 1 : vector<24x256xf32>, i32 -> vector<24x256xf32>
      %c3_31 = arith.constant 3 : index
      %c0_32 = arith.constant 0 : index
      %c0_33 = arith.constant 0 : index
      %67 = vector.load %arg7[%c3_31, %c0_32, %c0_33] : memref<9x1x256xf32, #tpu.memory_space<vmem>>, vector<1x1x256xf32>
      %68 = vector.shape_cast %67 : vector<1x1x256xf32> to vector<1x256xf32>
      %69 = vector.broadcast %68 : vector<1x256xf32> to vector<24x256xf32>
      %70 = arith.mulf %66, %69 : vector<24x256xf32>
      %71 = vector.broadcast %65 : vector<24x1xf32> to vector<24x256xf32>
      %72 = arith.mulf %70, %71 : vector<24x256xf32>
      %73 = arith.addf %63, %72 : vector<24x256xf32>
      %c4 = arith.constant 4 : index
      %c0_34 = arith.constant 0 : index
      %c0_35 = arith.constant 0 : index
      %74 = vector.load %arg4[%c4, %c0_34, %c0_35] : memref<9x24x1xf32, #tpu.memory_space<vmem>>, vector<1x24x1xf32>
      %75 = vector.shape_cast %74 : vector<1x24x1xf32> to vector<24x1xf32>
      %76 = vector.broadcast %75 : vector<24x1xf32> to vector<24x256xf32>
      %77 = arith.mulf %34, %76 : vector<24x256xf32>
      %78 = arith.addf %73, %77 : vector<24x256xf32>
      %c5 = arith.constant 5 : index
      %c0_36 = arith.constant 0 : index
      %c0_37 = arith.constant 0 : index
      %79 = vector.load %arg4[%c5, %c0_36, %c0_37] : memref<9x24x1xf32, #tpu.memory_space<vmem>>, vector<1x24x1xf32>
      %80 = vector.shape_cast %79 : vector<1x24x1xf32> to vector<24x1xf32>
      %c255_i32 = arith.constant 255 : i32
      %81 = tpu.dynamic_rotate %34 by %c255_i32 dim 1 : vector<24x256xf32>, i32 -> vector<24x256xf32>
      %c5_38 = arith.constant 5 : index
      %c0_39 = arith.constant 0 : index
      %c0_40 = arith.constant 0 : index
      %82 = vector.load %arg7[%c5_38, %c0_39, %c0_40] : memref<9x1x256xf32, #tpu.memory_space<vmem>>, vector<1x1x256xf32>
      %83 = vector.shape_cast %82 : vector<1x1x256xf32> to vector<1x256xf32>
      %84 = vector.broadcast %83 : vector<1x256xf32> to vector<24x256xf32>
      %85 = arith.mulf %81, %84 : vector<24x256xf32>
      %86 = vector.broadcast %80 : vector<24x1xf32> to vector<24x256xf32>
      %87 = arith.mulf %85, %86 : vector<24x256xf32>
      %88 = arith.addf %78, %87 : vector<24x256xf32>
      %c6 = arith.constant 6 : index
      %c0_41 = arith.constant 0 : index
      %c0_42 = arith.constant 0 : index
      %89 = vector.load %arg4[%c6, %c0_41, %c0_42] : memref<9x24x1xf32, #tpu.memory_space<vmem>>, vector<1x24x1xf32>
      %90 = vector.shape_cast %89 : vector<1x24x1xf32> to vector<24x1xf32>
      %c241_i32 = arith.constant 241 : i32
      %91 = tpu.dynamic_rotate %34 by %c241_i32 dim 1 : vector<24x256xf32>, i32 -> vector<24x256xf32>
      %c6_43 = arith.constant 6 : index
      %c0_44 = arith.constant 0 : index
      %c0_45 = arith.constant 0 : index
      %92 = vector.load %arg7[%c6_43, %c0_44, %c0_45] : memref<9x1x256xf32, #tpu.memory_space<vmem>>, vector<1x1x256xf32>
      %93 = vector.shape_cast %92 : vector<1x1x256xf32> to vector<1x256xf32>
      %94 = vector.broadcast %93 : vector<1x256xf32> to vector<24x256xf32>
      %95 = arith.mulf %91, %94 : vector<24x256xf32>
      %96 = vector.broadcast %90 : vector<24x1xf32> to vector<24x256xf32>
      %97 = arith.mulf %95, %96 : vector<24x256xf32>
      %98 = arith.addf %88, %97 : vector<24x256xf32>
      %c7 = arith.constant 7 : index
      %c0_46 = arith.constant 0 : index
      %c0_47 = arith.constant 0 : index
      %99 = vector.load %arg4[%c7, %c0_46, %c0_47] : memref<9x24x1xf32, #tpu.memory_space<vmem>>, vector<1x24x1xf32>
      %100 = vector.shape_cast %99 : vector<1x24x1xf32> to vector<24x1xf32>
      %c240_i32 = arith.constant 240 : i32
      %101 = tpu.dynamic_rotate %34 by %c240_i32 dim 1 : vector<24x256xf32>, i32 -> vector<24x256xf32>
      %c7_48 = arith.constant 7 : index
      %c0_49 = arith.constant 0 : index
      %c0_50 = arith.constant 0 : index
      %102 = vector.load %arg7[%c7_48, %c0_49, %c0_50] : memref<9x1x256xf32, #tpu.memory_space<vmem>>, vector<1x1x256xf32>
      %103 = vector.shape_cast %102 : vector<1x1x256xf32> to vector<1x256xf32>
      %104 = vector.broadcast %103 : vector<1x256xf32> to vector<24x256xf32>
      %105 = arith.mulf %101, %104 : vector<24x256xf32>
      %106 = vector.broadcast %100 : vector<24x1xf32> to vector<24x256xf32>
      %107 = arith.mulf %105, %106 : vector<24x256xf32>
      %108 = arith.addf %98, %107 : vector<24x256xf32>
      %c8 = arith.constant 8 : index
      %c0_51 = arith.constant 0 : index
      %c0_52 = arith.constant 0 : index
      %109 = vector.load %arg4[%c8, %c0_51, %c0_52] : memref<9x24x1xf32, #tpu.memory_space<vmem>>, vector<1x24x1xf32>
      %110 = vector.shape_cast %109 : vector<1x24x1xf32> to vector<24x1xf32>
      %c239_i32 = arith.constant 239 : i32
      %111 = tpu.dynamic_rotate %34 by %c239_i32 dim 1 : vector<24x256xf32>, i32 -> vector<24x256xf32>
      %c8_53 = arith.constant 8 : index
      %c0_54 = arith.constant 0 : index
      %c0_55 = arith.constant 0 : index
      %112 = vector.load %arg7[%c8_53, %c0_54, %c0_55] : memref<9x1x256xf32, #tpu.memory_space<vmem>>, vector<1x1x256xf32>
      %113 = vector.shape_cast %112 : vector<1x1x256xf32> to vector<1x256xf32>
      %114 = vector.broadcast %113 : vector<1x256xf32> to vector<24x256xf32>
      %115 = arith.mulf %111, %114 : vector<24x256xf32>
      %116 = vector.broadcast %110 : vector<24x1xf32> to vector<24x256xf32>
      %117 = arith.mulf %115, %116 : vector<24x256xf32>
      %118 = arith.addf %108, %117 : vector<24x256xf32>
      %c0_56 = arith.constant 0 : index
      %c0_57 = arith.constant 0 : index
      %119 = vector.load %arg5[%c0_56, %c0_57] : memref<24x24xf32, #tpu.memory_space<vmem>>, vector<24x24xf32>
      %120 = arith.truncf %119 : vector<24x24xf32> to vector<24x24xbf16>
      %121 = arith.truncf %118 : vector<24x256xf32> to vector<24x256xbf16>
      %cst_58 = arith.constant dense<0.000000e+00> : vector<24x256xf32>
      %122 = tpu.matmul %120, %121, %cst_58 {dimension_numbers = #tpu.dot_dimension_numbers<[1], [0], [0], [1], [0, 0, 1, 1], [], []>} : vector<24x24xbf16>, vector<24x256xbf16>, vector<24x256xf32> -> vector<24x256xf32>
      %c0_59 = arith.constant 0 : index
      %c0_60 = arith.constant 0 : index
      %123 = vector.load %arg6[%c0_59, %c0_60] : memref<24x1xf32, #tpu.memory_space<vmem>>, vector<24x1xf32>
      %124 = vector.broadcast %123 : vector<24x1xf32> to vector<24x256xf32>
      %125 = arith.addf %122, %124 : vector<24x256xf32>
      %126 = arith.truncf %125 : vector<24x256xf32> to vector<24x256xbf16>
      %c0_61 = arith.constant 0 : index
      %c0_62 = arith.constant 0 : index
      %127 = vector.load %arg9[%c0_61, %c0_62] : memref<24x256xbf16, #tpu.memory_space<vmem>>, vector<24x256xbf16>
      tpu.vector_store %arg9[%c0_61, %c0_62], %126 {strides = array<i32>} : memref<24x256xbf16, #tpu.memory_space<vmem>>, vector<24x256xbf16>,
    } else {
    }
    %c128_i32 = arith.constant 128 : i32
    %3 = arith.muli %arg1, %c128_i32 : i32
    %4 = tpu.assume_multiple %3, 128 : i32
    %c0 = arith.constant 0 : index
    %5 = arith.index_cast %4 : i32 to index
    %6 = vector.load %arg9[%c0, %5] : memref<24x256xbf16, #tpu.memory_space<vmem>>, vector<24x128xbf16>
    %7 = vector.shape_cast %6 : vector<24x128xbf16> to vector<24x8x16xbf16>
    %8 = tpu.transpose %7, [1, 0, 2] : vector<24x8x16xbf16> -> vector<8x24x16xbf16>
    %9 = vector.extract_strided_slice %8 {offsets = [0, 0, 0], sizes = [8, 8, 16], strides = [1, 1, 1]} : vector<8x24x16xbf16> to vector<8x8x16xbf16>
    %10 = vector.extract_strided_slice %8 {offsets = [0, 8, 0], sizes = [8, 8, 16], strides = [1, 1, 1]} : vector<8x24x16xbf16> to vector<8x8x16xbf16>
    %11 = vector.extract_strided_slice %8 {offsets = [0, 16, 0], sizes = [8, 8, 16], strides = [1, 1, 1]} : vector<8x24x16xbf16> to vector<8x8x16xbf16>
    "tpu.trace_start"() <{level = 10 : i32, message = "tcw,tdw->tcd"}> : () -> ()
    %cst = arith.constant dense<0.000000e+00> : vector<8x8x8xf32>
    %12 = tpu.matmul %9, %10, %cst {dimension_numbers = #tpu.dot_dimension_numbers<[2], [2], [1], [1], [0, 0, 0, 1, 1, 1], [0], [0]>} : vector<8x8x16xbf16>, vector<8x8x16xbf16>, vector<8x8x8xf32> -> vector<8x8x8xf32>
    "tpu.trace_stop"() : () -> ()
    %cst_1 = arith.constant dense<0xFF800000> : vector<8x8xf32>
    %13 = vector.multi_reduction <maximumf>, %12, %cst_1 [2] : vector<8x8x8xf32> to vector<8x8xf32>
    %14 = vector.shape_cast %13 : vector<8x8xf32> to vector<8x8x1xf32>
    %15 = vector.broadcast %14 : vector<8x8x1xf32> to vector<8x8x8xf32>
    %16 = arith.subf %12, %15 : vector<8x8x8xf32>
    %17 = math.exp %16 : vector<8x8x8xf32>
    %cst_2 = arith.constant dense<0.000000e+00> : vector<8x8xf32>
    %18 = vector.multi_reduction <add>, %17, %cst_2 [2] : vector<8x8x8xf32> to vector<8x8xf32>
    %19 = vector.shape_cast %18 : vector<8x8xf32> to vector<8x8x1xf32>
    %20 = tpu.reciprocal %19 {approx = true} : vector<8x8x1xf32> -> vector<8x8x1xf32>
    %21 = vector.broadcast %20 : vector<8x8x1xf32> to vector<8x8x8xf32>
    %22 = arith.mulf %17, %21 : vector<8x8x8xf32>
    %23 = arith.truncf %22 : vector<8x8x8xf32> to vector<8x8x8xbf16>
    "tpu.trace_start"() <{level = 10 : i32, message = "tcd,tdw->tcw"}> : () -> ()
    %cst_3 = arith.constant dense<0.000000e+00> : vector<8x8x16xf32>
    %24 = tpu.matmul %23, %11, %cst_3 {dimension_numbers = #tpu.dot_dimension_numbers<[2], [1], [1], [2], [0, 0, 0, 1, 1, 2], [0], [0]>} : vector<8x8x8xbf16>, vector<8x8x16xbf16>, vector<8x8x16xf32> -> vector<8x8x16xf32>
    "tpu.trace_stop"() : () -> ()
    %25 = tpu.transpose %24, [1, 0, 2] : vector<8x8x16xf32> -> vector<8x8x16xf32>
    %26 = vector.shape_cast %25 : vector<8x8x16xf32> to vector<8x128xf32>
    %c0_4 = arith.constant 0 : index
    %c0_5 = arith.constant 0 : index
    %c0_6 = arith.constant 0 : index
    %27 = vector.load %arg8[%c0_4, %c0_5, %c0_6] : memref<1x8x128xf32, #tpu.memory_space<vmem>>, vector<1x8x128xf32>
    %28 = vector.shape_cast %27 : vector<1x8x128xf32> to vector<8x128xf32>
    %29 = vector.shape_cast %26 : vector<8x128xf32> to vector<1x8x128xf32>
    tpu.vector_store %arg8[%c0_4, %c0_5, %c0_6], %29 {strides = array<i32>} : memref<1x8x128xf32, #tpu.memory_space<vmem>>, vector<1x8x128xf32>,
    return
  }
  func.func @transform_0(%arg0: i32, %arg1: i32) -> (i32, i32, i32) {
    %c0_i32 = arith.constant 0 : i32
    %c0_i32_0 = arith.constant 0 : i32
    %c0_i32_1 = arith.constant 0 : i32
    return %arg0, %c0_i32, %c0_i32_0 : i32, i32, i32
  }
  func.func @transform_1(%arg0: i32, %arg1: i32) -> (i32, i32, i32) {
    %c0_i32 = arith.constant 0 : i32
    %c0_i32_0 = arith.constant 0 : i32
    %c0_i32_1 = arith.constant 0 : i32
    return %arg0, %c0_i32, %c0_i32_0 : i32, i32, i32
  }
  func.func @transform_2(%arg0: i32, %arg1: i32) -> (i32, i32, i32) {
    %c0_i32 = arith.constant 0 : i32
    %c0_i32_0 = arith.constant 0 : i32
    %c0_i32_1 = arith.constant 0 : i32
    %c0_i32_2 = arith.constant 0 : i32
    return %c0_i32, %c0_i32_0, %c0_i32_1 : i32, i32, i32
  }
  func.func @transform_3(%arg0: i32, %arg1: i32) -> (i32, i32) {
    %c0_i32 = arith.constant 0 : i32
    %c0_i32_0 = arith.constant 0 : i32
    %c0_i32_1 = arith.constant 0 : i32
    return %c0_i32, %c0_i32_0 : i32, i32
  }
  func.func @transform_4(%arg0: i32, %arg1: i32) -> (i32, i32) {
    %c0_i32 = arith.constant 0 : i32
    %c0_i32_0 = arith.constant 0 : i32
    %c0_i32_1 = arith.constant 0 : i32
    return %c0_i32, %c0_i32_0 : i32, i32
  }
  func.func @transform_5(%arg0: i32, %arg1: i32) -> (i32, i32, i32) {
    %c0_i32 = arith.constant 0 : i32
    %c0_i32_0 = arith.constant 0 : i32
    %c0_i32_1 = arith.constant 0 : i32
    %c0_i32_2 = arith.constant 0 : i32
    return %c0_i32, %c0_i32_0, %c0_i32_1 : i32, i32, i32
  }
  func.func @transform_6(%arg0: i32, %arg1: i32) -> (i32, i32, i32) {
    %c0_i32 = arith.constant 0 : i32
    %c0_i32_0 = arith.constant 0 : i32
    return %arg0, %c0_i32, %arg1 : i32, i32, i32
  }
}

</mosaic_0001>

<bundles_post_ra>
// kernel: tpu_custom_call.1
= control target key start
LH: loop header
LB: loop body
LE: loop exit
PB: predicated region body
PF: predicated region fallthrough
CT: control target
= control target key end

     0   :  { %11 = vsyncpa [#allocation4], 0  ;;  %s4070_s0 = inlined_call_operand.vmem [shape: f32[2,8,256], index: 0, kind: input, shape index: {}]   ;;  %s4071_s1 = inlined_call_operand.vmem [shape: f32[2,8,256], index: 1, kind: input, shape index: {}]   ;;  %s4072_s2 = inlined_call_operand.vmem [shape: f32[9,24,1], index: 2, kind: input, shape index: {}]   ;;  %s4073_s3 = inlined_call_operand.vmem [shape: f32[24,24], index: 3, kind: input, shape index: {}]   ;;  %s4074_s4 = inlined_call_operand.vmem [shape: f32[24,1], index: 4, kind: input, shape index: {}]   ;;  %s4075_s5 = inlined_call_operand.vmem [shape: f32[9,1,256], index: 5, kind: input, shape index: {}]   ;;  %s4076_s6 = inlined_call_operand.hbm [shape: f32[2,8,256], index: 6, kind: output, shape index: {}]  }
   0x1   :  { %13 = vsyncpa [#allocation4 + $0x1], 0  ;;  %s3317_s21 = smov 0   ;;  %s3319_s22 = smov 0  }
   0x2   :  { %s3321_s23 = smov 0   ;;  %s3323_s24 = smov 0  }
   0x3   :  { %s3325_s25 = smov 0   ;;  %s3327_s26 = smov 0  }
   0x4   :  { %s3329_s27 = smov 0   ;;  %s3331_s28 = smov 0  }
   0x5 LB: > { %4081 = sst [smem:[#allocation6_spill]] %s3254_s27  ;;  %s2822_s29 = sadd.s32 4294967295, %s3258_s28   ;;  %s3258_s28 = sphi %s3331_s28, %s19_s28   ;;  %s3254_s27 = sphi %s3329_s27, %s4089_s27   ;;  %s3250_s26 = sphi %s3327_s26, %s4094_s26   ;;  %s3246_s25 = sphi %s3325_s25, %s4087_s25   ;;  %s3242_s24 = sphi %s3323_s24, %s4093_s24   ;;  %s3238_s23 = sphi %s3321_s23, %s4092_s23   ;;  %s3234_s22 = sphi %s3319_s22, %s4091_s22   ;;  %s3230_s21 = sphi %s3317_s21, %s4090_s21  }
   0x6   : > { %s2823_s30 = sadd.s32 4294967294, %s3258_s28   ;;  %s28_s7 = sadd.s32 1, %s3250_s26 }
   0x7   : > { %p29_p0 = scmp.ge.s32.totalorder %s28_s7, 2  ;;  %s31_s8 = sadd.s32 1, %s3254_s27 }
   0x8   : > { %p186_p1 = scmp.ne.s32.totalorder %s3238_s23, %s3234_s22  ;;  %p187_p2 = scmp.eq.s32.totalorder %s2822_s29, 3 }
   0x9   : > { %s4096_s7 = smov (%p29_p0, %s28_s7), 0  ;;  %s4098_s8 = smov (!%p29_p0, %s31_s8), %s3254_s27 }
   0xa   : > { %4082 = sst [smem:[#allocation7_spill]] %s4096_s7  ;;  %s172_s9 = ssub.s32 %s3250_s26, %s4096_s7 }
   0xb   : > { %p3368_p3 = por %p187_p2, %p186_p1  ;;  %p33_p4 = scmp.ge.s32.totalorder %s4098_s8, 2 }
   0xc   : > { %p192_p5 = scmp.ne.s32.totalorder %s3234_s22, %s3230_s21  ;;  %p193_p6 = scmp.eq.s32.totalorder %s2823_s30, 3 }
   0xd   : > { %p2826_p7 = scmp.ge.s32.totalorder %s3258_s28, 1  ;;  %s4100_s8 = smov (%p33_p4, %s4098_s8), 0 }
   0xe   : > { %4084 = sst [smem:[#allocation8_spill]] %s4100_s8  ;;  %p3377_p8 = por %p193_p6, %p192_p5 }
   0xf   : > { %p239_p9 = scmp.lt.s32.totalorder %s3258_s28, 5  ;;  %s171_s12 = ssub.s32 %s3254_s27, %s4100_s8 }
  0x10   : > { %s176_s13 = sadd.s32 1, %s3238_s23  ;;  %s173_s14 = sor.u32 %s172_s9, %s171_s12 }
  0x11   : > { %p240_p10 = pnand %p2826_p7, %p239_p9  ;;  %p174_p11 = scmp.eq.s32.totalorder %s173_s14, 0 }
  0x12   : > { %s4079_s16 = sand.u32 (!%p240_p10), 1, %s3234_s22   ;;  %p274_p12 = scmp.lt.s32.totalorder (!%p240_p10), %s3246_s25, 1 }
  0x13   : > { %s3386_s15 = scalar_select %p174_p11, %s3238_s23, %s176_s13  }
  0x14   : > { %243 = sbr.rel (%p240_p10) target bundleno = 1600 (0x640), region = 44  ;;  %s3392_s17 = sshll.u32 (!%p240_p10), %s4079_s16, 3 }
  0x15   : > { %s273_s14 = scalar_lea.vmem (!%p240_p10), [#allocation3], %s3392_s17  ;;  %p2832_p13 = scmp.ne.s32.totalorder (!%p240_p10), %s3242_s24, 0 }
  0x1b   : > { %s275_s18 = scalar_select %p274_p12, %s3246_s25, 1 }
  0x1c   : > { %288 = sbr.rel (%p2832_p13) target bundleno = 507 (0x1fb), region = 48  ;;  %v2833_v0 = vld [vmem:[%s4072_s2 + $0x18] sm:$0xff] (!%p2832_p13)  ;;  %v293_v1 = vld [vmem:[%s4072_s2] sm:$0xff] (!%p2832_p13)  ;;  %v3260_v2 = vmov (!%p2832_p13), 0   ;;  %v294_v4 = vld [vmem:[%s4072_s2 + $0x8] sm:$0xff] (!%p2832_p13)  ;;  %s3261_s9 = smov (!%p2832_p13), 17   ;;  %v304_v37 = vlaneseq (!%p2832_p13) }
  0x1d   : > { %s2901_s19 = sshll.u32 %s275_s18, 4  ;;  %3131 = vset.pattern.permute.xlu1 (!%p2832_p13), %v3260_v2  ;;  %3130 = vset.pattern.permute.xlu0 (!%p2832_p13), %v3260_v2  ;;  %v2834_v3 = vld [vmem:[%s4072_s2 + $0x20] sm:$0xff] (!%p2832_p13)  ;;  %v2838_v5 = vld [vmem:[%s4072_s2 + $0x38] sm:$0xff] (!%p2832_p13)  ;;  %v2837_v6 = vld [vmem:[%s4072_s2 + $0x30] sm:$0xff] (!%p2832_p13)  ;;  %s3262_s20 = smov (!%p2832_p13), 16   ;;  %vm840_vm8 = vcmask (!%p2832_p13), 1043456  }
  0x1e   : > { %s278_s30 = scalar_lea.vmem %s4070_s0, %s2901_s19  ;;  %s283_s13 = scalar_lea.vmem %s4071_s1, %s2901_s19  ;;  %384 = vperm.xlu1 (!%p2832_p13), %3131, %v2833_v0   ;;  %329 = vperm.xlu0 (!%p2832_p13), %3130, %v293_v1   ;;  %v295_v11 = vld [vmem:[%s4072_s2 + $0x10] sm:$0xff] (!%p2832_p13)  ;;  %v2835_v12 = vld [vmem:[%s4072_s2 + $0x28] sm:$0xff] (!%p2832_p13)  ;;  %v2845_v15 = vld [vmem:[%s4072_s2 + $0x60] sm:$0xff] (!%p2832_p13)  ;;  %v314_v40 = vshrl.u32 (!%p2832_p13), %v304_v37, 7  ;;  %v3537_v43 = vand.u32 (!%p2832_p13), 127, %v304_v37  ;;  %vm833_vm9 = vcmask (!%p2832_p13), 195584  }
  0x1f   : > { %879 = vmatprep.mubr.bf16.mxu0 (!%p2832_p13), %v3260_v2  ;;  %889 = vmatprep.mubr.bf16.mxu1 (!%p2832_p13), %v3260_v2  ;;  %v3421_v7 = vld [vmem:[%s283_s13] sm:$0xff] (!%p2832_p13)  ;;  %v3427_v9 = vld [vmem:[%s283_s13 + $0x8] sm:$0xff] (!%p2832_p13)  ;;  %v2842_v13 = vld [vmem:[%s4072_s2 + $0x50] sm:$0xff] (!%p2832_p13)  ;;  %s3263_s8 = smov (!%p2832_p13), 15   ;;  %s3264_s19 = smov (!%p2832_p13), 1  }
  0x20   : > { %v3423_v8 = vld [vmem:[%s278_s30] sm:$0xff] (!%p2832_p13)  ;;  %v3429_v10 = vld [vmem:[%s278_s30 + $0x8] sm:$0xff] (!%p2832_p13)  ;;  %v2843_v18 = vld [vmem:[%s4072_s2 + $0x58] sm:$0xff] (!%p2832_p13)  ;;  %s3265_s30 = smov (!%p2832_p13), 127   ;;  %s3266_s12 = smov (!%p2832_p13), 113   ;;  %v3539_v44 = vsub.s32 (!%p2832_p13), 0, %v314_v40 }
  0x21   : > { %v2841_v14 = vld [vmem:[%s4072_s2 + $0x48] sm:$0xff] (!%p2832_p13)  ;;  %v2839_v16 = vld [vmem:[%s4072_s2 + $0x40] sm:$0xff] (!%p2832_p13)  ;;  %v2848_v20 = vld [vmem:[%s4072_s2 + $0x78] sm:$0xff] (!%p2832_p13)  ;;  %s3267_s7 = smov (!%p2832_p13), 112   ;;  %s3268_s16 = smov (!%p2832_p13), 111   ;;  %v3541_v45 = vsub.s32 (!%p2832_p13), 1, %v314_v40 }
  0x22   : > { %389 = vperm.xlu1 (!%p2832_p13), %3131, %v2834_v3   ;;  %334 = vperm.xlu0 (!%p2832_p13), %3130, %v294_v4   ;;  %v2846_v17 = vld [vmem:[%s4072_s2 + $0x68] sm:$0xff] (!%p2832_p13)  ;;  %v2849_v19 = vld [vmem:[%s4072_s2 + $0x80] sm:$0xff] (!%p2832_p13)  ;;  %v2852_v21 = vld [vmem:[%s4072_s2 + $0x90] sm:$0xff] (!%p2832_p13)  ;;  %vm306_vm0 = vcmp.lt.s32.totalorder (!%p2832_p13), %v3537_v43, 17  ;;  %vm360_vm1 = vcmp.lt.s32.totalorder (!%p2832_p13), %v3537_v43, 16  ;;  %vm421_vm2 = vcmp.lt.s32.totalorder (!%p2832_p13), %v3537_v43, 15 }
  0x23   : > { %v2847_v22 = vld [vmem:[%s4072_s2 + $0x70] sm:$0xff]  ;;  %v2853_v23 = vld [vmem:[%s4072_s2 + $0x98] sm:$0xff]  ;;  %v2850_v24 = vld [vmem:[%s4072_s2 + $0x88] sm:$0xff]  ;;  %vm482_vm3 = vcmp.lt.s32.totalorder %v3537_v43, 1  ;;  %vm574_vm4 = vcmp.lt.s32.totalorder %v3537_v43, 127  ;;  %vm635_vm5 = vcmp.lt.s32.totalorder %v3537_v43, 113 }
  0x24   : > { %v2857_v25 = vld [vmem:[%s4072_s2 + $0xb0] sm:$0xff]  ;;  %v2856_v26 = vld [vmem:[%s4072_s2 + $0xa8] sm:$0xff]  ;;  %v2860_v27 = vld [vmem:[%s4072_s2 + $0xc0] sm:$0xff]  ;;  %vm696_vm6 = vcmp.lt.s32.totalorder %v3537_v43, 112  ;;  %vm757_vm7 = vcmp.lt.s32.totalorder %v3537_v43, 111 }
  0x25   : > { %v2854_v28 = vld [vmem:[%s4072_s2 + $0xa0] sm:$0xff]  ;;  %v2861_v29 = vld [vmem:[%s4072_s2 + $0xc8] sm:$0xff]  ;;  %v2858_v30 = vld [vmem:[%s4072_s2 + $0xb8] sm:$0xff] }
  0x26   : > { %450 = vperm.xlu1 %3131, %v2838_v5   ;;  %445 = vperm.xlu0 %3130, %v2837_v6   ;;  %v815_v31 = vld [vmem:[%s4074_s4] sm:$0xff]  ;;  %v2862_v32 = vld [vmem:[%s4072_s2 + $0xd0] sm:$0xff]  ;;  %v816_v34 = vld [vmem:[%s4074_s4 + $0x8] sm:$0xff] }
  0x27   : > { %v817_v33 = vld [vmem:[%s4074_s4 + $0x10] sm:$0xff]  ;;  %v311_v46 = vld [vmem:[%s4075_s5] sm:$0x3]  ;;  %v2836_v61 = vld [vmem:[%s4075_s5 + $0x2] sm:$0x3] }
  0x28   : > { %v316_v49 = vrot.slane %v311_v46, %v3539_v44  ;;  %v320_v50 = vrot.slane %v311_v46, %v3541_v45  ;;  %v371_v6 = vrot.slane %v2836_v61, %v3539_v44 }
  0x2a   : > { %298 = vrot.lane.b32.xlu1 %v3421_v7, %s3261_s9  ;;  %296 = vrot.lane.b32.xlu0 %v3423_v8, %s3261_s9 }
  0x2e   : > { %302 = vrot.lane.b32.xlu1 %v3427_v9, %s3261_s9  ;;  %300 = vrot.lane.b32.xlu0 %v3429_v10, %s3261_s9 }
  0x32   : > { %352 = vrot.lane.b32.xlu1 %v3423_v8, %s3262_s20  ;;  %339 = vperm.xlu0 %3130, %v295_v11   ;;  %v375_v11 = vrot.slane %v2836_v61, %v3541_v45 }
  0x36   : > { %356 = vrot.lane.b32.xlu1 %v3429_v10, %s3262_s20  ;;  %354 = vrot.lane.b32.xlu0 %v3421_v7, %s3262_s20 }
  0x3a   : > { %394 = vperm.xlu1 %3131, %v2835_v12   ;;  %358 = vrot.lane.b32.xlu0 %v3427_v9, %s3262_s20 }
  0x3e   : > { %511 = vperm.xlu1 %3131, %v2842_v13   ;;  %506 = vperm.xlu0 %3130, %v2841_v14  }
  0x42   : > { %415 = vrot.lane.b32.xlu1 %v3421_v7, %s3263_s8  ;;  %413 = vrot.lane.b32.xlu0 %v3423_v8, %s3263_s8 }
  0x46   : > { %419 = vrot.lane.b32.xlu1 %v3427_v9, %s3263_s8  ;;  %417 = vrot.lane.b32.xlu0 %v3429_v10, %s3263_s8 }
  0x4a   : > { %537 = vperm.xlu1 %3131, %v2845_v15   ;;  %455 = vperm.xlu0 %3130, %v2839_v16  }
  0x4e   : > { %474 = vrot.lane.b32.xlu1 %v3423_v8, %s3264_s19  ;;  %542 = vperm.xlu0 %3130, %v2846_v17  }
  0x52   : > { %478 = vrot.lane.b32.xlu1 %v3429_v10, %s3264_s19  ;;  %476 = vrot.lane.b32.xlu0 %v3421_v7, %s3264_s19 }
  0x56   : > { %516 = vperm.xlu1 %3131, %v2843_v18   ;;  %480 = vrot.lane.b32.xlu0 %v3427_v9, %s3264_s19 }
  0x5a   : > { %603 = vperm.xlu1 %3131, %v2849_v19   ;;  %598 = vperm.xlu0 %3130, %v2848_v20  }
  0x5e   : > { %659 = vperm.xlu1 %3131, %v2852_v21   ;;  %547 = vperm.xlu0 %3130, %v2847_v22  }
  0x62   : > { %566 = vrot.lane.b32.xlu1 %v3423_v8, %s3265_s30  ;;  %664 = vperm.xlu0 %3130, %v2853_v23  }
  0x66   : > { %570 = vrot.lane.b32.xlu1 %v3429_v10, %s3265_s30  ;;  %568 = vrot.lane.b32.xlu0 %v3421_v7, %s3265_s30 }
  0x6a   : > { %608 = vperm.xlu1 %3131, %v2850_v24   ;;  %572 = vrot.lane.b32.xlu0 %v3427_v9, %s3265_s30 }
  0x6e   : > { %725 = vperm.xlu1 %3131, %v2857_v25   ;;  %720 = vperm.xlu0 %3130, %v2856_v26  }
  0x72   : > { %629 = vrot.lane.b32.xlu1 %v3421_v7, %s3266_s12  ;;  %627 = vrot.lane.b32.xlu0 %v3423_v8, %s3266_s12 }
  0x76   : > { %633 = vrot.lane.b32.xlu1 %v3427_v9, %s3266_s12  ;;  %631 = vrot.lane.b32.xlu0 %v3429_v10, %s3266_s12 }
  0x7a   : > { %781 = vperm.xlu1 %3131, %v2860_v27   ;;  %669 = vperm.xlu0 %3130, %v2854_v28  }
  0x7e   : > { %688 = vrot.lane.b32.xlu1 %v3423_v8, %s3267_s7  ;;  %786 = vperm.xlu0 %3130, %v2861_v29  }
  0x82   : > { %692 = vrot.lane.b32.xlu1 %v3429_v10, %s3267_s7  ;;  %690 = vrot.lane.b32.xlu0 %v3421_v7, %s3267_s7 }
  0x86   : > { %730 = vperm.xlu1 %3131, %v2858_v30   ;;  %694 = vrot.lane.b32.xlu0 %v3427_v9, %s3267_s7 }
  0x8a   : > { %751 = vrot.lane.b32.xlu1 %v3421_v7, %s3268_s16  ;;  %749 = vrot.lane.b32.xlu0 %v3423_v8, %s3268_s16 }
  0x8e   : > { %755 = vrot.lane.b32.xlu1 %v3427_v9, %s3268_s16  ;;  %753 = vrot.lane.b32.xlu0 %v3429_v10, %s3268_s16 }
  0x92   : > { %820 = vperm.xlu1 %3131, %v815_v31   ;;  %791 = vperm.xlu0 %3130, %v2862_v32  }
  0x96   : > { %830 = vperm.xlu1 %3131, %v817_v33   ;;  %825 = vperm.xlu0 %3130, %v816_v34  }
  0x9d   : > { %v385_v35 = vpop.permute.xlu1 %384  ;;  %v330_v36 = vpop.permute.xlu0 %329 }
  0xa1   : > { %v390_v38 = vpop.permute.xlu1 %389  ;;  %v335_v39 = vpop.permute.xlu0 %334 }
  0xa5   : > { %v3533_v41 = vpop.permute.xlu1 %450  ;;  %v3535_v42 = vpop.permute.xlu0 %445 }
  0xa9   : > { %v299_v47 = vpop.permute.xlu1 %298  ;;  %v297_v48 = vpop.permute.xlu0 %296 }
  0xad   : > { %v303_v51 = vpop.permute.xlu1 %302  ;;  %v301_v52 = vpop.permute.xlu0 %300 }
  0xae   : > { %v308_v53 = vsel %vm306_vm0, %v299_v47, %v303_v51  ;;  %v310_v54 = vsel %vm306_vm0, %v303_v51, %v299_v47  ;;  %v307_v55 = vsel %vm306_vm0, %v297_v48, %v301_v52  ;;  %v309_v56 = vsel %vm306_vm0, %v301_v52, %v297_v48 }
  0xaf   : > { %v325_v57 = vmul.f32 %v316_v49, %v310_v54  ;;  %v326_v58 = vmul.f32 %v320_v50, %v308_v53  ;;  %v323_v59 = vmul.f32 %v316_v49, %v309_v56  ;;  %v324_v60 = vmul.f32 %v320_v50, %v307_v55 }
  0xb1   : > { %v344_v62 = vmul.f32 %v335_v39, %v325_v57  ;;  %v345_v63 = vmul.f32 %v335_v39, %v326_v58  ;;  %v342_v0 = vmul.f32 %v330_v36, %v323_v59  ;;  %v343_v1 = vmul.f32 %v330_v36, %v324_v60  ;;  %v353_v2 = vpop.permute.xlu1 %352  ;;  %v340_v3 = vpop.permute.xlu0 %339  ;;  %v2840_v39 = vld [vmem:[%s4075_s5 + $0x4] sm:$0x3] }
  0xb2   : > { %v346_v4 = vmul.f32 %v340_v3, %v323_v59  ;;  %v347_v5 = vmul.f32 %v340_v3, %v324_v60  ;;  %v432_v47 = vrot.slane %v2840_v39, %v3539_v44  ;;  %v436_v48 = vrot.slane %v2840_v39, %v3541_v45 }
  0xb5   : > { %v357_v12 = vpop.permute.xlu1 %356  ;;  %v355_v13 = vpop.permute.xlu0 %354 }
  0xb6   : > { %v361_v14 = vsel %vm360_vm1, %v353_v2, %v357_v12  ;;  %v363_v15 = vsel %vm360_vm1, %v357_v12, %v353_v2 }
  0xb7   : > { %v378_v16 = vmul.f32 %v371_v6, %v363_v15  ;;  %v379_v17 = vmul.f32 %v375_v11, %v361_v14 }
  0xb9   : > { %v397_v18 = vmul.f32 %v385_v35, %v378_v16  ;;  %v398_v19 = vmul.f32 %v385_v35, %v379_v17  ;;  %v395_v20 = vpop.permute.xlu1 %394  ;;  %v359_v21 = vpop.permute.xlu0 %358 }
  0xba   : > { %v401_v22 = vmul.f32 %v395_v20, %v378_v16  ;;  %v402_v23 = vmul.f32 %v395_v20, %v379_v17  ;;  %v362_v24 = vsel %vm360_vm1, %v355_v13, %v359_v21  ;;  %v364_v25 = vsel %vm360_vm1, %v359_v21, %v355_v13 }
  0xbb   : > { %v403_v26 = vadd.f32 %v397_v18, %v342_v0  ;;  %v404_v27 = vadd.f32 %v398_v19, %v343_v1  ;;  %v380_v28 = vmul.f32 %v371_v6, %v364_v25  ;;  %v381_v29 = vmul.f32 %v375_v11, %v362_v24 }
  0xbc   : > { %v407_v30 = vadd.f32 %v401_v22, %v346_v4  ;;  %v408_v31 = vadd.f32 %v402_v23, %v347_v5 }
  0xbd   : > { %v399_v32 = vmul.f32 %v390_v38, %v380_v28  ;;  %v400_v33 = vmul.f32 %v390_v38, %v381_v29  ;;  %v512_v34 = vpop.permute.xlu1 %511  ;;  %v507_v35 = vpop.permute.xlu0 %506 }
  0xbf   : > { %v405_v36 = vadd.f32 %v399_v32, %v344_v62  ;;  %v406_v37 = vadd.f32 %v400_v33, %v345_v63 }
  0xc1   : > { %v416_v40 = vpop.permute.xlu1 %415  ;;  %v414_v46 = vpop.permute.xlu0 %413 }
  0xc5   : > { %v420_v49 = vpop.permute.xlu1 %419  ;;  %v418_v50 = vpop.permute.xlu0 %417 }
  0xc6   : > { %v423_v51 = vsel %vm421_vm2, %v416_v40, %v420_v49  ;;  %v425_v38 = vsel %vm421_vm2, %v420_v49, %v416_v40  ;;  %v422_v52 = vsel %vm421_vm2, %v414_v46, %v418_v50  ;;  %v424_v53 = vsel %vm421_vm2, %v418_v50, %v414_v46 }
  0xc7   : > { %v441_v54 = vmul.f32 %v432_v47, %v425_v38  ;;  %v442_v55 = vmul.f32 %v436_v48, %v423_v51  ;;  %v439_v56 = vmul.f32 %v432_v47, %v424_v53  ;;  %v440_v57 = vmul.f32 %v436_v48, %v422_v52 }
  0xc9   : > { %v460_v58 = vmul.f32 %v3533_v41, %v441_v54  ;;  %v461_v59 = vmul.f32 %v3533_v41, %v442_v55  ;;  %v458_v60 = vmul.f32 %v3535_v42, %v439_v56  ;;  %v459_v61 = vmul.f32 %v3535_v42, %v440_v57  ;;  %v3573_v62 = vpop.permute.xlu1 %537  ;;  %v456_v63 = vpop.permute.xlu0 %455  ;;  %v2844_v41 = vld [vmem:[%s4075_s5 + $0x6] sm:$0x3] }
  0xca   : > { %v462_v0 = vmul.f32 %v456_v63, %v439_v56  ;;  %v463_v1 = vmul.f32 %v456_v63, %v440_v57  ;;  %v493_v42 = vrot.slane %v2844_v41, %v3539_v44  ;;  %v497_v14 = vrot.slane %v2844_v41, %v3541_v45  ;;  %v2859_v63 = vld [vmem:[%s4075_s5 + $0xe] sm:$0x3] }
  0xcb   : > { %v466_v2 = vadd.f32 %v460_v58, %v405_v36  ;;  %v467_v3 = vadd.f32 %v461_v59, %v406_v37  ;;  %v464_v4 = vadd.f32 %v458_v60, %v403_v26  ;;  %v465_v5 = vadd.f32 %v459_v61, %v404_v27  ;;  %v2851_v58 = vld [vmem:[%s4075_s5 + $0xa] sm:$0x3]  ;;  %v2855_v59 = vld [vmem:[%s4075_s5 + $0xc] sm:$0x3] }
  0xcc   : > { %v3575_v6 = vadd.f32 %v462_v0, %v407_v30  ;;  %v3577_v11 = vadd.f32 %v463_v1, %v408_v31  ;;  %v550_v25 = vmul.f32 %v3573_v62, %v3423_v8  ;;  %v585_v0 = vrot.slane %v2851_v58, %v3539_v44 }
  0xcd   : > { %v475_v12 = vpop.permute.xlu1 %474  ;;  %v3582_v13 = vpop.permute.xlu0 %542  ;;  %v589_v1 = vrot.slane %v2851_v58, %v3541_v45  ;;  %v650_v41 = vrot.slane %v2855_v59, %v3541_v45 }
  0xd1   : > { %v479_v15 = vpop.permute.xlu1 %478  ;;  %v477_v16 = vpop.permute.xlu0 %476 }
  0xd2   : > { %v483_v17 = vsel %vm482_vm3, %v475_v12, %v479_v15  ;;  %v485_v18 = vsel %vm482_vm3, %v479_v15, %v475_v12  ;;  %v707_v12 = vrot.slane %v2859_v63, %v3539_v44 }
  0xd3   : > { %v500_v19 = vmul.f32 %v493_v42, %v485_v18  ;;  %v501_v20 = vmul.f32 %v497_v14, %v483_v17  ;;  %v711_v18 = vrot.slane %v2859_v63, %v3541_v45 }
  0xd5   : > { %v519_v21 = vmul.f32 %v507_v35, %v500_v19  ;;  %v520_v22 = vmul.f32 %v507_v35, %v501_v20  ;;  %v517_v23 = vpop.permute.xlu1 %516  ;;  %v481_v24 = vpop.permute.xlu0 %480 }
  0xd6   : > { %v484_v26 = vsel %vm482_vm3, %v477_v16, %v481_v24  ;;  %v486_v27 = vsel %vm482_vm3, %v481_v24, %v477_v16  ;;  %v524_v15 = vmul.f32 %v517_v23, %v501_v20 }
  0xd7   : > { %v525_v28 = vadd.f32 %v519_v21, %v464_v4  ;;  %v526_v29 = vadd.f32 %v520_v22, %v465_v5  ;;  %v502_v30 = vmul.f32 %v493_v42, %v486_v27  ;;  %v503_v31 = vmul.f32 %v497_v14, %v484_v26 }
  0xd8   : > { %v646_v5 = vrot.slane %v2855_v59, %v3539_v44  ;;  %v551_v42 = vmul.f32 %v3573_v62, %v3429_v10  ;;  %v552_v14 = vmul.f32 %v3582_v13, %v3421_v7  ;;  %v553_v62 = vmul.f32 %v3582_v13, %v3427_v9 }
  0xd9   : > { %v521_v32 = vmul.f32 %v512_v34, %v502_v30  ;;  %v522_v33 = vmul.f32 %v512_v34, %v503_v31  ;;  %v3589_v36 = vpop.permute.xlu1 %603  ;;  %v599_v37 = vpop.permute.xlu0 %598  ;;  %v3591_v39 = vadd.f32 %v550_v25, %v525_v28  ;;  %v530_v9 = vadd.f32 %v524_v15, %v3577_v11 }
  0xda   : > { %v557_v13 = vadd.f32 %v551_v42, %v526_v29 }
  0xdb   : > { %v527_v40 = vadd.f32 %v521_v32, %v466_v2  ;;  %v528_v35 = vadd.f32 %v522_v33, %v467_v3  ;;  %v523_v2 = vmul.f32 %v517_v23, %v500_v19 }
  0xdd   : > { %v3593_v46 = vpop.permute.xlu1 %659  ;;  %v548_v47 = vpop.permute.xlu0 %547  ;;  %v529_v25 = vadd.f32 %v523_v2, %v3575_v6  ;;  %v558_v33 = vadd.f32 %v552_v14, %v527_v40 }
  0xde   : > { %v554_v7 = vmul.f32 %v548_v47, %v3423_v8  ;;  %v555_v20 = vmul.f32 %v548_v47, %v3429_v10  ;;  %v559_v47 = vadd.f32 %v553_v62, %v528_v35 }
  0xe1   : > { %v567_v48 = vpop.permute.xlu1 %566  ;;  %v3595_v49 = vpop.permute.xlu0 %664 }
  0xe5   : > { %v571_v50 = vpop.permute.xlu1 %570  ;;  %v569_v51 = vpop.permute.xlu0 %568 }
  0xe6   : > { %v575_v3 = vsel %vm574_vm4, %v567_v48, %v571_v50  ;;  %v577_v4 = vsel %vm574_vm4, %v571_v50, %v567_v48 }
  0xe7   : > { %v592_v19 = vmul.f32 %v585_v0, %v575_v3  ;;  %v593_v21 = vmul.f32 %v589_v1, %v577_v4  ;;  %v2863_v4 = vld [vmem:[%s4075_s5 + $0x10] sm:$0x3] }
  0xe8   : > { %v772_v62 = vrot.slane %v2863_v4, %v3541_v45 }
  0xe9   : > { %v609_v38 = vpop.permute.xlu1 %608  ;;  %v573_v52 = vpop.permute.xlu0 %572  ;;  %v611_v10 = vmul.f32 %v599_v37, %v592_v19  ;;  %v612_v32 = vmul.f32 %v599_v37, %v593_v21 }
  0xea   : > { %v576_v22 = vsel %vm574_vm4, %v569_v51, %v573_v52  ;;  %v578_v24 = vsel %vm574_vm4, %v573_v52, %v569_v51 }
  0xeb   : > { %v594_v6 = vmul.f32 %v585_v0, %v576_v22  ;;  %v595_v30 = vmul.f32 %v589_v1, %v578_v24  ;;  %v617_v59 = vadd.f32 %v611_v10, %v3591_v39  ;;  %v618_v63 = vadd.f32 %v612_v32, %v557_v13 }
  0xed   : > { %v3597_v53 = vpop.permute.xlu1 %725  ;;  %v3599_v34 = vpop.permute.xlu0 %720  ;;  %v613_v11 = vmul.f32 %v3589_v36, %v594_v6  ;;  %v614_v29 = vmul.f32 %v3589_v36, %v595_v30 }
  0xef   : > { %v619_v14 = vadd.f32 %v613_v11, %v558_v33  ;;  %v620_v15 = vadd.f32 %v614_v29, %v559_v47 }
  0xf1   : > { %v630_v54 = vpop.permute.xlu1 %629  ;;  %v628_v55 = vpop.permute.xlu0 %627 }
  0xf5   : > { %v634_v56 = vpop.permute.xlu1 %633  ;;  %v632_v57 = vpop.permute.xlu0 %631 }
  0xf6   : > { %v637_v23 = vsel %vm635_vm5, %v630_v54, %v634_v56  ;;  %v639_v26 = vsel %vm635_vm5, %v634_v56, %v630_v54  ;;  %v636_v27 = vsel %vm635_vm5, %v628_v55, %v632_v57  ;;  %v638_v28 = vsel %vm635_vm5, %v632_v57, %v628_v55 }
  0xf7   : > { %v655_v48 = vmul.f32 %v646_v5, %v637_v23  ;;  %v656_v50 = vmul.f32 %v650_v41, %v639_v26  ;;  %v653_v51 = vmul.f32 %v646_v5, %v636_v27  ;;  %v654_v52 = vmul.f32 %v650_v41, %v638_v28 }
  0xf8   : > { %v560_v54 = vadd.f32 %v554_v7, %v529_v25  ;;  %v561_v56 = vadd.f32 %v555_v20, %v530_v9  ;;  %v615_v55 = vmul.f32 %v609_v38, %v592_v19  ;;  %v616_v57 = vmul.f32 %v609_v38, %v593_v21 }
  0xf9   : > { %v3608_v60 = vpop.permute.xlu1 %781  ;;  %v3610_v61 = vpop.permute.xlu0 %669  ;;  %v674_v1 = vmul.f32 %v3595_v49, %v655_v48  ;;  %v675_v36 = vmul.f32 %v3595_v49, %v656_v50  ;;  %v672_v2 = vmul.f32 %v3593_v46, %v653_v51  ;;  %v673_v3 = vmul.f32 %v3593_v46, %v654_v52 }
  0xfa   : > { %v677_v19 = vmul.f32 %v3610_v61, %v654_v52  ;;  %v621_v22 = vadd.f32 %v615_v55, %v560_v54  ;;  %v622_v24 = vadd.f32 %v616_v57, %v561_v56  ;;  %v768_v46 = vrot.slane %v2863_v4, %v3539_v44 }
  0xfb   : > { %v680_v25 = vadd.f32 %v674_v1, %v619_v14  ;;  %v681_v7 = vadd.f32 %v675_v36, %v620_v15  ;;  %v678_v20 = vadd.f32 %v672_v2, %v617_v59  ;;  %v679_v23 = vadd.f32 %v673_v3, %v618_v63  ;;  %v807_v36 = vld [vmem:[%s4073_s3 + $0x8] sm:$0xff]  ;;  %v808_v2 = vld [vmem:[%s4073_s3 + $0x10] sm:$0xff] }
  0xfc   : > { %v683_v28 = vadd.f32 %v677_v19, %v622_v24 }
  0xfd   : > { %v689_v16 = vpop.permute.xlu1 %688  ;;  %v3630_v17 = vpop.permute.xlu0 %786 }
 0x101   : > { %v693_v8 = vpop.permute.xlu1 %692  ;;  %v691_v31 = vpop.permute.xlu0 %690 }
 0x102   : > { %v697_v58 = vsel %vm696_vm6, %v689_v16, %v693_v8  ;;  %v699_v37 = vsel %vm696_vm6, %v693_v8, %v689_v16  ;;  %v676_v16 = vmul.f32 %v3610_v61, %v653_v51 }
 0x103   : > { %v714_v39 = vmul.f32 %v707_v12, %v697_v58  ;;  %v715_v5 = vmul.f32 %v711_v18, %v699_v37 }
 0x104   : > { %v682_v27 = vadd.f32 %v676_v16, %v621_v22 }
 0x105   : > { %v731_v40 = vpop.permute.xlu1 %730  ;;  %v695_v35 = vpop.permute.xlu0 %694 }
 0x106   : > { %v698_v0 = vsel %vm696_vm6, %v691_v31, %v695_v35  ;;  %v700_v38 = vsel %vm696_vm6, %v695_v35, %v691_v31  ;;  %v737_v9 = vmul.f32 %v731_v40, %v714_v39  ;;  %v738_v13 = vmul.f32 %v731_v40, %v715_v5 }
 0x107   : > { %v716_v41 = vmul.f32 %v707_v12, %v698_v0  ;;  %v717_v42 = vmul.f32 %v711_v18, %v700_v38  ;;  %v733_v12 = vmul.f32 %v3599_v34, %v714_v39  ;;  %v734_v18 = vmul.f32 %v3599_v34, %v715_v5 }
 0x108   : > { %v743_v57 = vadd.f32 %v737_v9, %v682_v27  ;;  %v744_v43 = vadd.f32 %v738_v13, %v683_v28  ;;  %v810_v39 = vpack.c.bf16 %v808_v2, %v808_v2 }
 0x109   : > { %v752_v21 = vpop.permute.xlu1 %751  ;;  %v750_v49 = vpop.permute.xlu0 %749  ;;  %v735_v26 = vmul.f32 %v3597_v53, %v716_v41  ;;  %v736_v61 = vmul.f32 %v3597_v53, %v717_v42  ;;  %v740_v33 = vadd.f32 %v734_v18, %v679_v23  ;;  %v739_v48 = vadd.f32 %v733_v12, %v678_v20 }
 0x10b   : > { %v742_v47 = vadd.f32 %v736_v61, %v681_v7  ;;  %v741_v50 = vadd.f32 %v735_v26, %v680_v25 }
 0x10d   : > { %v756_v6 = vpop.permute.xlu1 %755  ;;  %v754_v44 = vpop.permute.xlu0 %753 }
 0x10e   : > { %v759_v45 = vsel %vm757_vm7, %v752_v21, %v756_v6  ;;  %v761_v30 = vsel %vm757_vm7, %v756_v6, %v752_v21  ;;  %v758_v8 = vsel %vm757_vm7, %v750_v49, %v754_v44  ;;  %v760_v34 = vsel %vm757_vm7, %v754_v44, %v750_v49 }
 0x10f   : > { %v777_v31 = vmul.f32 %v768_v46, %v759_v45  ;;  %v778_v53 = vmul.f32 %v772_v62, %v761_v30  ;;  %v775_v10 = vmul.f32 %v768_v46, %v758_v8  ;;  %v776_v32 = vmul.f32 %v772_v62, %v760_v34 }
 0x111   : > { %v796_v51 = vmul.f32 %v3630_v17, %v777_v31  ;;  %v797_v52 = vmul.f32 %v3630_v17, %v778_v53  ;;  %v794_v54 = vmul.f32 %v3608_v60, %v775_v10  ;;  %v795_v56 = vmul.f32 %v3608_v60, %v776_v32  ;;  %v792_v55 = vpop.permute.xlu0 %791  ;;  %v806_v60 = vld [vmem:[%s4073_s3] sm:$0xff]  ;;  %v821_v5 = vpop.permute.xlu1 %820 }
 0x112   : > { %v798_v11 = vmul.f32 %v792_v55, %v775_v10  ;;  %v799_v29 = vmul.f32 %v792_v55, %v776_v32  ;;  %v809_v4 = vpack.c.bf16 %v807_v36, %v806_v60 }
 0x113   : > { %v801_v58 = vadd.f32 %v795_v56, %v740_v33  ;;  %v803_v37 = vadd.f32 %v797_v52, %v742_v47  ;;  %v800_v40 = vadd.f32 %v794_v54, %v739_v48  ;;  %v802_v35 = vadd.f32 %v796_v51, %v741_v50 }
 0x114   : > { %v804_v59 = vadd.f32 %v798_v11, %v743_v57  ;;  %v805_v63 = vadd.f32 %v799_v29, %v744_v43 }
 0x115   : > { %v812_v0 = vpack.c.bf16 %v803_v37, %v801_v58  ;;  %v811_v38 = vpack.c.bf16 %v802_v35, %v800_v40  ;;  %v831_v41 = vpop.permute.xlu1 %830  ;;  %v826_v42 = vpop.permute.xlu0 %825 }
 0x116   : > { %v814_v1 = vpack.c.bf16 %v805_v63, %v805_v63  ;;  %v813_v17 = vpack.c.bf16 %v804_v59, %v804_v59 }
 0x117   : > { %847 = vmatprep.subr.bf16.mxu0 %v812_v0  ;;  %3034 = vmatprep.subr.bf16.mxu1 %v812_v0 }
 0x118   : > { %848 = vmatpush1.bf16.msra.mxu0 %v811_v38  ;;  %3036 = vmatpush1.bf16.msra.mxu1 %v811_v38  ;;  %v842_v3 = vsel %vm840_vm8, %v813_v17, 0 }
 0x119   : > { %2864 = vmatprep.subr.msk.bf16.mxu0 %vm840_vm8, %v814_v1  ;;  %3035 = vmatprep.subr.msk.bf16.mxu1 %vm840_vm8, %v814_v1 }
 0x11c   : > { %850 = vmatpush1.bf16.msra.mxu0 %v842_v3  ;;  %3037 = vmatpush1.bf16.msra.mxu1 %v842_v3 }
 0x11f   : > { %2865 = vmatmul.mubr.msk.bf16.vlgmr.msra.gmra.mrb[0].mxu0 %vm833_vm9, %v809_v4  ;;  %2866 = vmatmul.mubr.msk.bf16.vlgmr.msra.gmra.mrb[0].mxu1 %vm833_vm9, %v810_v39 }
 0x1f2   : > { %v881_v14 = vpop.f32.mrb[0].mxu0  ;;  %v891_v15 = vpop.f32.mrb[0].mxu1 }
 0x1f3   : > { %v882_v16 = vadd.f32 %v881_v14, %v821_v5  ;;  %v892_v19 = vadd.f32 %v891_v15, %v831_v41  ;;  %v883_v21 = vpop.f32.mrb[1].mxu0  ;;  %v893_v49 = vpop.f32.mrb[1].mxu1 }
 0x1f4   : > { %v884_v22 = vadd.f32 %v883_v21, %v821_v5  ;;  %v894_v24 = vadd.f32 %v893_v49, %v831_v41  ;;  %v885_v46 = vpop.f32.mrb[2].mxu0  ;;  %v895_v62 = vpop.f32.mrb[2].mxu1 }
 0x1f5   : > { %v886_v25 = vadd.f32 %v885_v46, %v826_v42  ;;  %v887_v7 = vpop.f32.mrb[3].mxu0  ;;  %v896_v20 = vpop.f32.mrb[3].mxu1 }
 0x1f6   : > { %v2903_v23 = vpack.c.bf16 %v884_v22, %v882_v16  ;;  %v2905_v12 = vpack.c.bf16 %v894_v24, %v892_v19  ;;  %v888_v18 = vadd.f32 %v887_v7, %v826_v42 }
 0x1f8   : > { %918 = vst [vmem:[#allocation2] sm:$0xff] %v2903_v23  ;;  %920 = vst [vmem:[#allocation2 + $0x10] sm:$0xff] %v2905_v12  ;;  %v2904_v26 = vpack.c.bf16 %v888_v18, %v886_v25 }
 0x1fa   : > { %919 = vst [vmem:[#allocation2 + $0x8] sm:$0xff] %v2904_v26 }
 0x1fb PF: > { %s2870_s30 = sshll.u32 %s3242_s24, 7  ;;  %s3269_s8 = smov 80   ;;  %v3276_v28 = vmov 0.0   ;;  %vm3277_vm10 = vmmov 0   ;;  %v3278_v9 = vmov 1983009808   ;;  %v999_v6 = vlaneseq }
 0x1fc   : > { %s922_s29 = sshra.s32 %s2870_s30, 7  ;;  %s3270_s16 = smov 112   ;;  %2938 = vmatprep.subr.bf16.mxu0 %v3276_v28  ;;  %2944 = vmatprep.subr.bf16.mxu1 %v3276_v28  ;;  %v997_v13 = vunpack.c.l.s4 %v3278_v9  ;;  %v3279_v34 = vmov 1934713408   ;;  %v3280_v38 = vmov 0   ;;  %vm1571_vm11 = vcmask 130048  }
 0x1fd   : > { %s2871_s7 = sshll.u32 %s922_s29, 2  ;;  %s3271_s9 = smov 64   ;;  %2940 = vmatprep.mubr.msk.bf16.mxu0 %vm3277_vm10, %v3276_v28  ;;  %2946 = vmatprep.mubr.msk.bf16.mxu1 %vm3277_vm10, %v3276_v28  ;;  %v1000_v8 = vshrl.u32 %v999_v6, 7  ;;  %v1014_v31 = vunpack.c.l.s4 %v3279_v34  ;;  %vm1940_vm12 = vcmask 64512   ;;  %vm2040_vm13 = vcmask 1043456  }
 0x1fe   : > { %s3700_s27 = scalar_lea.vmem [#allocation2], %s2871_s7  ;;  %s3272_s12 = smov 96   ;;  %v998_v30 = vunpack.c.0.s8 %v997_v13  ;;  %vm2707_vm14 = vcmask 261120   ;;  %vm2709_vm15 = vcmask 392192   ;;  %vm2711_vm0 = vcmask 523264  }
 0x1ff   : > { %s3273_s18 = smov 32   ;;  %s3274_s20 = smov 48   ;;  %v1015_v47 = vunpack.c.0.s8 %v1014_v31  ;;  %vm2713_vm1 = vcmask 654336   ;;  %vm2715_vm2 = vcmask 785408   ;;  %vm2717_vm3 = vcmask 916480  }
 0x200   : > { %s3275_s13 = smov 16   ;;  %v3733_v32 = vsub.s32 %v998_v30, %v1000_v8  ;;  %s2897_s19 = sshll.u32 %s3246_s25, 1 }
 0x201   : > { %v927_v61 = vld [vmem:[%s3700_s27 + $0x8] sm:$0xf]  ;;  %v3710_v27 = vld [vmem:[%s3700_s27] sm:$0xf]  ;;  %v3736_v54 = vsub.s32 %v1015_v47, %v1000_v8  ;;  %s2732_s30 = sadd.s32 %s3242_s24, %s2897_s19  ;;  %s2736_s7 = sshll.u32 %s273_s14, 4  ;;  %s4015_s7 = int_to_ptr.vmem [resolvable:$true] %s2736_s7 }
 0x202   : > { %952 = vrot.lane.b32.xlu1 %v927_v61, %s3269_s8  ;;  %934 = vrot.lane.b32.xlu0 %v927_v61, %s3270_s16  ;;  %s2898_s29 = sshll.u32 %s2732_s30, 7 }
 0x203   : > { %s4013_s24 = scalar_lea.hbm %s4076_s6, %s2898_s29 }
 0x206   : > { %961 = vrot.lane.b32.xlu1 %v927_v61, %s3271_s9  ;;  %943 = vrot.lane.b32.xlu0 %v927_v61, %s3272_s12 }
 0x20a   : > { %979 = vrot.lane.b32.xlu1 %v927_v61, %s3273_s18  ;;  %970 = vrot.lane.b32.xlu0 %v927_v61, %s3274_s20 }
 0x20e   : > { %988 = vrot.lane.b32.xlu0 %v927_v61, %s3275_s13  ;;  %932 = vrot.lane.b32.xlu1 %v3710_v27, %s3270_s16 }
 0x212   : > { %941 = vrot.lane.b32.xlu0 %v3710_v27, %s3272_s12  ;;  %950 = vrot.lane.b32.xlu1 %v3710_v27, %s3269_s8 }
 0x216   : > { %959 = vrot.lane.b32.xlu0 %v3710_v27, %s3271_s9  ;;  %968 = vrot.lane.b32.xlu1 %v3710_v27, %s3274_s20 }
 0x21a   : > { %977 = vrot.lane.b32.xlu0 %v3710_v27, %s3273_s18  ;;  %986 = vrot.lane.b32.xlu1 %v3710_v27, %s3275_s13 }
 0x274   : > { %v953_v44 = vpop.permute.xlu1 %952  ;;  %v935_v45 = vpop.permute.xlu0 %934 }
 0x278   : > { %v962_v53 = vpop.permute.xlu1 %961  ;;  %v944_v10 = vpop.permute.xlu0 %943 }
 0x279   : > { %v1063_v33 = vcombine.low %v927_v61, %v962_v53 }
 0x27b   : > { %v1070_v52 = vrot.slane %v1063_v33, %v3733_v32 }
 0x27c   : > { %v980_v48 = vpop.permute.xlu1 %979  ;;  %v971_v50 = vpop.permute.xlu0 %970 }
 0x27d   : > { %v1071_v51 = vcombine.low %v944_v10, %v980_v48  ;;  %v1097_v55 = vcombine.low %v935_v45, %v971_v50 }
 0x27f   : > { %v1078_v56 = vrot.slane %v1071_v51, %v3733_v32  ;;  %v1104_v59 = vrot.slane %v1097_v55, %v3733_v32 }
 0x280   : > { %v989_v57 = vpop.permute.xlu0 %988  ;;  %v933_v43 = vpop.permute.xlu1 %932 }
 0x281   : > { %v1079_v11 = vcombine.low %v1070_v52, %v1078_v56  ;;  %v1080_v29 = vcombine.high %v1070_v52, %v1078_v56  ;;  %v1105_v58 = vcombine.low %v953_v44, %v989_v57 }
 0x283   : > { %v1087_v37 = vrot.slane %v1079_v11, %v3736_v54  ;;  %v1094_v40 = vrot.slane %v1080_v29, %v3736_v54  ;;  %v1112_v35 = vrot.slane %v1105_v58, %v3733_v32 }
 0x284   : > { %v942_v63 = vpop.permute.xlu0 %941  ;;  %v951_v0 = vpop.permute.xlu1 %950 }
 0x285   : > { %v1095_v1 = vcombine.high %v1087_v37, %v3280_v38  ;;  %v1113_v17 = vcombine.low %v1104_v59, %v1112_v35  ;;  %v1114_v60 = vcombine.high %v1104_v59, %v1112_v35  ;;  %v1096_v36 = vcombine.high %v1094_v40, %v3280_v38 }
 0x286   : > { %v1235_v5 = vshrl.u32 %v1087_v37, 16  ;;  %v1251_v42 = vshrl.u32 %v1094_v40, 16 }
 0x287   : > { %v1121_v2 = vrot.slane %v1113_v17, %v3736_v54  ;;  %v1128_v3 = vrot.slane %v1114_v60, %v3736_v54  ;;  %v1243_v41 = vshrl.u32 %v1095_v1, 16  ;;  %v1259_v49 = vshrl.u32 %v1096_v36, 16 }
 0x288   : > { %v960_v4 = vpop.permute.xlu0 %959  ;;  %v969_v39 = vpop.permute.xlu1 %968 }
 0x289   : > { %v995_v14 = vcombine.low %v3710_v27, %v960_v4  ;;  %v1129_v15 = vcombine.high %v1121_v2, %v3280_v38  ;;  %v1130_v16 = vcombine.high %v1128_v3, %v3280_v38  ;;  %v1233_v19 = vpack.i.b16 %v1121_v2, %v1087_v37 }
 0x28a   : > { %v1236_v21 = vshrl.u32 %v1121_v2, 16  ;;  %v1249_v22 = vpack.i.b16 %v1128_v3, %v1094_v40  ;;  %v1252_v24 = vshrl.u32 %v1128_v3, 16  ;;  %v1029_v46 = vcombine.low %v933_v43, %v969_v39 }
 0x28b   : > { %v1241_v25 = vpack.i.b16 %v1129_v15, %v1095_v1  ;;  %v1244_v7 = vshrl.u32 %v1129_v15, 16  ;;  %v1257_v20 = vpack.i.b16 %v1130_v16, %v1096_v36  ;;  %v1260_v26 = vshrl.u32 %v1130_v16, 16 }
 0x28c   : > { %v1237_v62 = vpack.i.b16 %v1236_v21, %v1235_v5  ;;  %v978_v23 = vpop.permute.xlu0 %977  ;;  %v987_v12 = vpop.permute.xlu1 %986  ;;  %v1253_v18 = vpack.i.b16 %v1252_v24, %v1251_v42  ;;  %v1002_v9 = vrot.slane %v995_v14, %v3733_v32  ;;  %v1363_v6 = vcombine.low %v1233_v19, %v1249_v22 }
 0x28d   : > { %v1003_v61 = vcombine.low %v942_v63, %v978_v23  ;;  %v1037_v27 = vcombine.low %v951_v0, %v987_v12  ;;  %v1245_v13 = vpack.i.b16 %v1244_v7, %v1243_v41  ;;  %v1371_v44 = vcombine.low %v1241_v25, %v1257_v20 }
 0x28e   : > { %v1036_v45 = vrot.slane %v1029_v46, %v3733_v32  ;;  %v1261_v34 = vpack.i.b16 %v1260_v26, %v1259_v49  ;;  %v3755_v31 = vrot.slane %v1363_v6, %v3733_v32  ;;  %v1397_v10 = vcombine.low %v1237_v62, %v1253_v18 }
 0x28f   : > { %v1010_v30 = vrot.slane %v1003_v61, %v3733_v32  ;;  %v1044_v8 = vrot.slane %v1037_v27, %v3733_v32  ;;  %v3758_v53 = vrot.slane %v1371_v44, %v3733_v32 }
 0x290   : > { %v1405_v52 = vcombine.low %v1245_v13, %v1261_v34  ;;  %v1404_v29 = vrot.slane %v1397_v10, %v3733_v32 }
 0x291   : > { %v1011_v33 = vcombine.low %v1002_v9, %v1010_v30  ;;  %v1012_v47 = vcombine.high %v1002_v9, %v1010_v30  ;;  %v1045_v48 = vcombine.low %v1036_v45, %v1044_v8  ;;  %v1046_v50 = vcombine.high %v1036_v45, %v1044_v8 }
 0x292   : > { %v1379_v51 = vcombine.low %v3755_v31, %v3758_v53  ;;  %v1412_v58 = vrot.slane %v1405_v52, %v3733_v32 }
 0x293   : > { %v1019_v56 = vrot.slane %v1011_v33, %v3736_v54  ;;  %v1026_v55 = vrot.slane %v1012_v47, %v3736_v54  ;;  %v1053_v57 = vrot.slane %v1045_v48, %v3736_v54  ;;  %v1060_v43 = vrot.slane %v1046_v50, %v3736_v54 }
 0x294   : > { %v1387_v11 = vrot.slane %v1379_v51, %v3736_v54  ;;  %v1413_v16 = vcombine.low %v1404_v29, %v1412_v58  ;;  %v1414_v6 = vcombine.high %v1404_v29, %v1412_v58  ;;  %v1380_v47 = vcombine.high %v3755_v31, %v3758_v53 }
 0x295   : > { %v1027_v37 = vcombine.high %v1019_v56, %v3280_v38  ;;  %v1028_v40 = vcombine.high %v1026_v55, %v3280_v38  ;;  %v1203_v35 = vshrl.u32 %v1019_v56, 16  ;;  %v1219_v59 = vshrl.u32 %v1026_v55, 16 }
 0x296   : > { %v1061_v63 = vcombine.high %v1053_v57, %v3280_v38  ;;  %v1062_v0 = vcombine.high %v1060_v43, %v3280_v38  ;;  %v1201_v1 = vpack.i.b16 %v1053_v57, %v1019_v56  ;;  %v1204_v17 = vshrl.u32 %v1053_v57, 16 }
 0x297   : > { %v1211_v60 = vshrl.u32 %v1027_v37, 16  ;;  %v1227_v36 = vshrl.u32 %v1028_v40, 16  ;;  %v1217_v2 = vpack.i.b16 %v1060_v43, %v1026_v55  ;;  %v1220_v3 = vshrl.u32 %v1060_v43, 16 }
 0x298   : > { %v1205_v4 = vpack.i.b16 %v1204_v17, %v1203_v35  ;;  %v1209_v39 = vpack.i.b16 %v1061_v63, %v1027_v37  ;;  %v1212_v5 = vshrl.u32 %v1061_v63, 16  ;;  %v1225_v41 = vpack.i.b16 %v1062_v0, %v1028_v40 }
 0x299   : > { %v1221_v42 = vpack.i.b16 %v1220_v3, %v1219_v59  ;;  %v1228_v14 = vshrl.u32 %v1062_v0, 16  ;;  %v1295_v15 = vcombine.low %v1201_v1, %v1217_v2  ;;  %v1421_v24 = vrot.slane %v1413_v16, %v3736_v54 }
 0x29a   : > { %v1213_v19 = vpack.i.b16 %v1212_v5, %v1211_v60  ;;  %v1303_v21 = vcombine.low %v1209_v39, %v1225_v41  ;;  %v1526_v20 = vshrl.u32 %v1387_v11, 16  ;;  %v1395_v18 = vcombine.high %v1387_v11, %v3280_v38 }
 0x29b   : > { %v1229_v49 = vpack.i.b16 %v1228_v14, %v1227_v36  ;;  %v1329_v22 = vcombine.low %v1205_v4, %v1221_v42  ;;  %v3775_v46 = vrot.slane %v1295_v15, %v3733_v32  ;;  %v1525_v7 = vpack.i.b16 %v1421_v24, %v1387_v11 }
 0x29c   : > { %v3778_v62 = vrot.slane %v1303_v21, %v3733_v32  ;;  %v1527_v23 = vshrl.u32 %v1421_v24, 16  ;;  %v1429_v26 = vcombine.high %v1421_v24, %v3280_v38  ;;  %v1532_v33 = vshrl.u32 %v1395_v18, 16 }
 0x29d   : > { %v1337_v25 = vcombine.low %v1213_v19, %v1229_v49  ;;  %v1576_v61 = vsel %vm1571_vm11, %v1525_v7, 0  ;;  %v1336_v9 = vrot.slane %v1329_v22, %v3733_v32  ;;  %v1428_v48 = vrot.slane %v1414_v6, %v3736_v54 }
 0x29e   : > { %v1311_v12 = vcombine.low %v3775_v46, %v3778_v62  ;;  %v1528_v27 = vpack.i.b16 %v1527_v23, %v1526_v20  ;;  %2939 = vmatpush3.bf16.xpose.msra.mxu0 %v1576_v61  ;;  %v1533_v8 = vshrl.u32 %v1429_v26, 16  ;;  %v1531_v10 = vpack.i.b16 %v1429_v26, %v1395_v18 }
 0x29f   : > { %v1344_v13 = vrot.slane %v1337_v25, %v3733_v32  ;;  %2950 = vmatprep.subr.bf16.mxu0 %v3276_v28  ;;  %v1394_v11 = vrot.slane %v1380_v47, %v3736_v54  ;;  %v1539_v29 = vshrl.u32 %v1428_v48, 16  ;;  %v1312_v59 = vcombine.high %v3775_v46, %v3778_v62 }
 0x2a0   : > { %v1622_v44 = vsel %vm1571_vm11, %v1528_v27, 0  ;;  %v1319_v45 = vrot.slane %v1311_v12, %v3736_v54  ;;  %v1534_v56 = vpack.i.b16 %v1533_v8, %v1532_v33  ;;  %v1668_v55 = vsel %vm1571_vm11, %v1531_v10, 0 }
 0x2a1   : > { %v1345_v30 = vcombine.low %v1336_v9, %v1344_v13  ;;  %2945 = vmatpush3.bf16.xpose.msra.mxu1 %v1622_v44  ;;  %v1346_v58 = vcombine.high %v1336_v9, %v1344_v13  ;;  %v1537_v37 = vpack.i.b16 %v1428_v48, %v1394_v11  ;;  %v1538_v35 = vshrl.u32 %v1394_v11, 16 }
 0x2a2   : > { %2956 = vmatprep.subr.bf16.mxu1 %v3276_v28  ;;  %v1502_v51 = vshrl.u32 %v1319_v45, 16  ;;  %v1714_v31 = vsel %vm1571_vm11, %v1534_v56, 0  ;;  %v1327_v53 = vcombine.high %v1319_v45, %v3280_v38  ;;  %v1430_v17 = vcombine.high %v1428_v48, %v3280_v38 }
 0x2a3   : > { %v1353_v34 = vrot.slane %v1345_v30, %v3736_v54  ;;  %v1540_v1 = vpack.i.b16 %v1539_v29, %v1538_v35  ;;  %v1760_v60 = vsel %vm1571_vm11, %v1537_v37, 0  ;;  %v1360_v2 = vrot.slane %v1346_v58, %v3736_v54 }
 0x2a4   : > { %v1508_v0 = vshrl.u32 %v1327_v53, 16  ;;  %v1396_v3 = vcombine.high %v1394_v11, %v3280_v38  ;;  %v1326_v39 = vrot.slane %v1312_v59, %v3736_v54  ;;  %v1545_v5 = vshrl.u32 %v1430_v17, 16 }
 0x2a5   : > { %v1501_v50 = vpack.i.b16 %v1353_v34, %v1319_v45  ;;  %v1503_v52 = vshrl.u32 %v1353_v34, 16  ;;  %v1361_v43 = vcombine.high %v1353_v34, %v3280_v38  ;;  %v1806_v4 = vsel %vm1571_vm11, %v1540_v1, 0 }
 0x2a6   : > { %v1543_v41 = vpack.i.b16 %v1430_v17, %v1396_v3  ;;  %v1515_v42 = vshrl.u32 %v1360_v2, 16  ;;  %v1544_v14 = vshrl.u32 %v1396_v3, 16  ;;  %v1513_v15 = vpack.i.b16 %v1360_v2, %v1326_v39 }
 0x2a7   : > { %2941 = vmatmul.mubr.msk.bf16.vlgmr.msra.gmra.mrb[0].mxu0 %vm1571_vm11, %v1501_v50  ;;  %v1504_v57 = vpack.i.b16 %v1503_v52, %v1502_v51  ;;  %v1509_v40 = vshrl.u32 %v1361_v43, 16  ;;  %v1507_v63 = vpack.i.b16 %v1361_v43, %v1327_v53  ;;  %v1514_v16 = vshrl.u32 %v1326_v39, 16 }
 0x2a8   : > { %2951 = vmatpush3.bf16.xpose.msra.mxu0 %v1668_v55  ;;  %2952 = vmatprep.mubr.msk.bf16.mxu0 %vm3277_vm10, %v3276_v28  ;;  %v1546_v19 = vpack.i.b16 %v1545_v5, %v1544_v14  ;;  %v1852_v21 = vsel %vm1571_vm11, %v1543_v41, 0  ;;  %v1362_v22 = vcombine.high %v1360_v2, %v3280_v38  ;;  %v1328_v46 = vcombine.high %v1326_v39, %v3280_v38  ;;  %v3851_v2 = vld [vmem:[%s3700_s27 + $0x10] sm:$0xf] }
 0x2a9   : > { %2947 = vmatmul.mubr.msk.bf16.vlgmr.msra.gmra.mrb[0].mxu1 %vm1571_vm11, %v1504_v57  ;;  %2962 = vmatprep.subr.bf16.mxu0 %v3276_v28  ;;  %v1510_v36 = vpack.i.b16 %v1509_v40, %v1508_v0  ;;  %v1516_v49 = vpack.i.b16 %v1515_v42, %v1514_v16 }
 0x2aa   : > { %2957 = vmatpush3.bf16.xpose.msra.mxu1 %v1714_v31  ;;  %2958 = vmatprep.mubr.msk.bf16.mxu1 %vm3277_vm10, %v3276_v28  ;;  %v1898_v24 = vsel %vm1571_vm11, %v1546_v19, 0  ;;  %v1521_v62 = vshrl.u32 %v1362_v22, 16  ;;  %v1519_v25 = vpack.i.b16 %v1362_v22, %v1328_v46  ;;  %v1520_v7 = vshrl.u32 %v1328_v46, 16 }
 0x2ab   : > { %2968 = vmatprep.subr.bf16.mxu1 %v3276_v28 }
 0x2ac   : > { %v1522_v20 = vpack.i.b16 %v1521_v62, %v1520_v7 }
 0x2af   : > { %2953 = vmatmul.mubr.msk.bf16.vlgmr.msra.gmra.mrb[4].mxu0 %vm1571_vm11, %v1507_v63 }
 0x2b0   : > { %2963 = vmatpush3.bf16.xpose.msra.mxu0 %v1760_v60  ;;  %2964 = vmatprep.mubr.msk.bf16.mxu0 %vm3277_vm10, %v3276_v28 }
 0x2b1   : > { %2959 = vmatmul.mubr.msk.bf16.vlgmr.msra.gmra.mrb[4].mxu1 %vm1571_vm11, %v1510_v36  ;;  %2974 = vmatprep.subr.bf16.mxu0 %v3276_v28 }
 0x2b2   : > { %2969 = vmatpush3.bf16.xpose.msra.mxu1 %v1806_v4  ;;  %2970 = vmatprep.mubr.msk.bf16.mxu1 %vm3277_vm10, %v3276_v28 }
 0x2b3   : > { %2980 = vmatprep.subr.bf16.mxu1 %v3276_v28 }
 0x2b7   : > { %2965 = vmatmul.mubr.msk.bf16.vlgmr.msra.gmra.mrb[8].mxu0 %vm1571_vm11, %v1513_v15 }
 0x2b8   : > { %2975 = vmatpush3.bf16.xpose.msra.mxu0 %v1852_v21  ;;  %2976 = vmatprep.mubr.msk.bf16.mxu0 %vm3277_vm10, %v3276_v28 }
 0x2b9   : > { %2971 = vmatmul.mubr.msk.bf16.vlgmr.msra.gmra.mrb[8].mxu1 %vm1571_vm11, %v1516_v49  ;;  %2986 = vmatprep.subr.bf16.mxu0 %v3276_v28 }
 0x2ba   : > { %2981 = vmatpush3.bf16.xpose.msra.mxu1 %v1898_v24  ;;  %2982 = vmatprep.mubr.msk.bf16.mxu1 %vm3277_vm10, %v3276_v28 }
 0x2bb   : > { %2992 = vmatprep.subr.bf16.mxu1 %v3276_v28 }
 0x2bf   : > { %2977 = vmatmul.mubr.msk.bf16.vlgmr.msra.gmra.mrb[12].mxu0 %vm1571_vm11, %v1519_v25 }
 0x2c0   : > { %2988 = vmatprep.mubr.msk.bf16.mxu0 %vm3277_vm10, %v3276_v28 }
 0x2c1   : > { %2983 = vmatmul.mubr.msk.bf16.vlgmr.msra.gmra.mrb[12].mxu1 %vm1571_vm11, %v1522_v20 }
 0x2c2   : > { %2994 = vmatprep.mubr.msk.bf16.mxu1 %vm3277_vm10, %v3276_v28 }
 0x37a   : > { %v1612_v23 = vpop.f32.mrb[0].mxu0 }
 0x37b   : > { %v2942_v12 = vpop.f32.mrb[1].mxu0  ;;  %v1941_v18 = vsel %vm1940_vm12, %v1612_v23, -inf }
 0x37c   : > { %v1658_v26 = vpop.f32.mrb[0].mxu1  ;;  %1942 = vmax.xlane.f32.xlu0 %v1941_v18  ;;  %v1615_v61 = vpop.f32.mrb[2].mxu0 }
 0x37d   : > { %v2943_v27 = vpop.f32.mrb[3].mxu0  ;;  %v2948_v9 = vpop.f32.mrb[1].mxu1  ;;  %v1944_v13 = vsel %vm1940_vm12, %v1658_v26, -inf }
 0x37e   : > { %1945 = vmax.xlane.f32.xlu1 %v1944_v13  ;;  %v1661_v6 = vpop.f32.mrb[2].mxu1 }
 0x37f   : > { %v2949_v44 = vpop.f32.mrb[3].mxu1 }
 0x382   : > { %v1704_v45 = vpop.f32.mrb[4].mxu0 }
 0x383   : > { %v2954_v30 = vpop.f32.mrb[5].mxu0  ;;  %v1947_v8 = vsel %vm1940_vm12, %v1704_v45, -inf }
 0x384   : > { %v1750_v34 = vpop.f32.mrb[4].mxu1  ;;  %1948 = vmax.xlane.f32.xlu0 %v1947_v8  ;;  %v1707_v10 = vpop.f32.mrb[6].mxu0 }
 0x385   : > { %v2955_v33 = vpop.f32.mrb[7].mxu0  ;;  %v2960_v47 = vpop.f32.mrb[5].mxu1  ;;  %v1950_v51 = vsel %vm1940_vm12, %v1750_v34, -inf }
 0x386   : > { %v1753_v48 = vpop.f32.mrb[6].mxu1 }
 0x387   : > { %v2961_v50 = vpop.f32.mrb[7].mxu1 }
 0x388   : > { %1951 = vmax.xlane.f32.xlu0 %v1950_v51 }
 0x38a   : > { %v1796_v52 = vpop.f32.mrb[8].mxu0 }
 0x38b   : > { %v2966_v56 = vpop.f32.mrb[9].mxu0  ;;  %v1953_v55 = vsel %vm1940_vm12, %v1796_v52, -inf }
 0x38c   : > { %v1842_v57 = vpop.f32.mrb[8].mxu1  ;;  %1954 = vmax.xlane.f32.xlu1 %v1953_v55  ;;  %v1799_v43 = vpop.f32.mrb[10].mxu0 }
 0x38d   : > { %v2967_v11 = vpop.f32.mrb[11].mxu0  ;;  %v2972_v31 = vpop.f32.mrb[9].mxu1  ;;  %v1956_v53 = vsel %vm1940_vm12, %v1842_v57, -inf }
 0x38e   : > { %v1845_v29 = vpop.f32.mrb[10].mxu1  ;;  %1957 = vmax.xlane.f32.xlu0 %v1956_v53 }
 0x38f   : > { %v2973_v58 = vpop.f32.mrb[11].mxu1 }
 0x392   : > { %v1888_v37 = vpop.f32.mrb[12].mxu0 }
 0x393   : > { %v2978_v40 = vpop.f32.mrb[13].mxu0  ;;  %v1959_v35 = vsel %vm1940_vm12, %v1888_v37, -inf }
 0x394   : > { %v1934_v59 = vpop.f32.mrb[12].mxu1  ;;  %1960 = vmax.xlane.f32.xlu1 %v1959_v35  ;;  %v1891_v63 = vpop.f32.mrb[14].mxu0 }
 0x395   : > { %v2979_v0 = vpop.f32.mrb[15].mxu0  ;;  %v2984_v1 = vpop.f32.mrb[13].mxu1  ;;  %v1962_v17 = vsel %vm1940_vm12, %v1934_v59, -inf }
 0x396   : > { %v1937_v60 = vpop.f32.mrb[14].mxu1  ;;  %1963 = vmax.xlane.f32.xlu0 %v1962_v17 }
 0x397   : > { %v2985_v36 = vpop.f32.mrb[15].mxu1 }
 0x3a5   : > { %936 = vrot.lane.b32.xlu1 %v3851_v2, %s3270_s16 }
 0x3a9   : > { %954 = vrot.lane.b32.xlu1 %v3851_v2, %s3269_s8 }
 0x3ac   : > { %945 = vrot.lane.b32.xlu0 %v3851_v2, %s3272_s12 }
 0x3ad   : > { %963 = vrot.lane.b32.xlu1 %v3851_v2, %s3271_s9 }
 0x3b0   : > { %972 = vrot.lane.b32.xlu0 %v3851_v2, %s3274_s20 }
 0x3b1   : > { %981 = vrot.lane.b32.xlu1 %v3851_v2, %s3273_s18 }
 0x3b4   : > { %990 = vrot.lane.b32.xlu0 %v3851_v2, %s3275_s13 }
 0x409   : > { %v1943_v3 = vpop.xlane.xlu0 %1942 }
 0x40a   : > { %v1965_v4 = vsub.f32 %v1612_v23, %v1943_v3 }
 0x40b   : > { %v1946_v39 = vpop.xlane.xlu1 %1945 }
 0x40c   : > { %v1973_v5 = vmul.f32 1.442695, %v1965_v4  ;;  %v1966_v41 = vsub.f32 %v1658_v26, %v1946_v39 }
 0x40e   : > { %3132 = vpow2.f32 %v1973_v5  ;;  %v1975_v42 = vmul.f32 1.442695, %v1966_v41 }
 0x410   : > { %3134 = vpow2.f32 %v1975_v42 }
 0x411   : > { %v1949_v14 = vpop.xlane.xlu0 %1948 }
 0x412   : > { %v1967_v15 = vsub.f32 %v1704_v45, %v1949_v14 }
 0x414   : > { %v1977_v16 = vmul.f32 1.442695, %v1967_v15 }
 0x415   : > { %v1952_v19 = vpop.xlane.xlu0 %1951 }
 0x416   : > { %3136 = vpow2.f32 %v1977_v16  ;;  %v1968_v21 = vsub.f32 %v1750_v34, %v1952_v19 }
 0x418   : > { %v3867_v49 = vpop.eup %3132  ;;  %v1979_v22 = vmul.f32 1.442695, %v1968_v21 }
 0x419   : > { %v1955_v24 = vpop.xlane.xlu1 %1954  ;;  %v1989_v46 = vsel %vm1940_vm12, %v3867_v49, 0.0 }
 0x41a   : > { %v3871_v62 = vpop.eup %3134  ;;  %3138 = vpow2.f32 %v1979_v22  ;;  %v1969_v25 = vsub.f32 %v1796_v52, %v1955_v24  ;;  %1990 = vadd.xlane.f32.xlu1 %v1989_v46 }
 0x41b   : > { %v1958_v7 = vpop.xlane.xlu0 %1957  ;;  %v1992_v20 = vsel %vm1940_vm12, %v3871_v62, 0.0 }
 0x41c   : > { %v1981_v23 = vmul.f32 1.442695, %v1969_v25  ;;  %v1970_v12 = vsub.f32 %v1842_v57, %v1958_v7  ;;  %1993 = vadd.xlane.f32.xlu0 %v1992_v20 }
 0x41e   : > { %3140 = vpow2.f32 %v1981_v23  ;;  %v1983_v18 = vmul.f32 1.442695, %v1970_v12 }
 0x420   : > { %v3875_v26 = vpop.eup %3136  ;;  %3142 = vpow2.f32 %v1983_v18 }
 0x421   : > { %v1961_v61 = vpop.xlane.xlu1 %1960  ;;  %v1995_v27 = vsel %vm1940_vm12, %v3875_v26, 0.0 }
 0x422   : > { %v1971_v9 = vsub.f32 %v1888_v37, %v1961_v61  ;;  %1996 = vadd.xlane.f32.xlu0 %v1995_v27 }
 0x423   : > { %v1964_v13 = vpop.xlane.xlu0 %1963 }
 0x424   : > { %v3879_v6 = vpop.eup %3138  ;;  %v1985_v44 = vmul.f32 1.442695, %v1971_v9  ;;  %v1972_v45 = vsub.f32 %v1934_v59, %v1964_v13 }
 0x425   : > { %v1998_v30 = vsel %vm1940_vm12, %v3879_v6, 0.0  ;;  %v937_v8 = vpop.permute.xlu1 %936 }
 0x426   : > { %3144 = vpow2.f32 %v1985_v44  ;;  %v1987_v34 = vmul.f32 1.442695, %v1972_v45  ;;  %1999 = vadd.xlane.f32.xlu1 %v1998_v30 }
 0x427   : > { %v946_v10 = vpop.permute.xlu0 %945 }
 0x428   : > { %v3883_v33 = vpop.eup %3140  ;;  %3146 = vpow2.f32 %v1987_v34 }
 0x429   : > { %v2001_v47 = vsel %vm1940_vm12, %v3883_v33, 0.0  ;;  %v955_v48 = vpop.permute.xlu1 %954 }
 0x42a   : > { %v3887_v50 = vpop.eup %3142  ;;  %2002 = vadd.xlane.f32.xlu0 %v2001_v47 }
 0x42b   : > { %v2004_v51 = vsel %vm1940_vm12, %v3887_v50, 0.0  ;;  %v973_v52 = vpop.permute.xlu0 %972 }
 0x42c   : > { %2005 = vadd.xlane.f32.xlu1 %v2004_v51  ;;  %v1165_v56 = vcombine.low %v937_v8, %v973_v52 }
 0x42d   : > { %v964_v55 = vpop.permute.xlu1 %963 }
 0x42e   : > { %v1131_v57 = vcombine.low %v3851_v2, %v964_v55  ;;  %v1172_v31 = vrot.slane %v1165_v56, %v3733_v32 }
 0x42f   : > { %v991_v43 = vpop.permute.xlu0 %990 }
 0x430   : > { %v3892_v11 = vpop.eup %3144  ;;  %v1173_v53 = vcombine.low %v955_v48, %v991_v43  ;;  %v1138_v40 = vrot.slane %v1131_v57, %v3733_v32 }
 0x431   : > { %v2007_v29 = vsel %vm1940_vm12, %v3892_v11, 0.0  ;;  %v982_v58 = vpop.permute.xlu1 %981 }
 0x432   : > { %v3897_v37 = vpop.eup %3146  ;;  %2008 = vadd.xlane.f32.xlu0 %v2007_v29  ;;  %v1180_v35 = vrot.slane %v1173_v53, %v3733_v32  ;;  %v1139_v59 = vcombine.low %v946_v10, %v982_v58 }
 0x433   : > { %v2010_v63 = vsel %vm1940_vm12, %v3897_v37, 0.0 }
 0x434   : > { %2011 = vadd.xlane.f32.xlu1 %v2010_v63  ;;  %v1181_v0 = vcombine.low %v1172_v31, %v1180_v35  ;;  %v1182_v1 = vcombine.high %v1172_v31, %v1180_v35  ;;  %v1146_v17 = vrot.slane %v1139_v59, %v3733_v32 }
 0x436   : > { %v1189_v60 = vrot.slane %v1181_v0, %v3736_v54  ;;  %v1196_v36 = vrot.slane %v1182_v1, %v3736_v54  ;;  %v1147_v2 = vcombine.low %v1138_v40, %v1146_v17  ;;  %v1148_v3 = vcombine.high %v1138_v40, %v1146_v17 }
 0x438   : > { %v1197_v4 = vcombine.high %v1189_v60, %v3280_v38  ;;  %v1198_v39 = vcombine.high %v1196_v36, %v3280_v38  ;;  %v1268_v5 = vshrl.u32 %v1189_v60, 16  ;;  %v1155_v41 = vrot.slane %v1147_v2, %v3736_v54 }
 0x439   : > { %v1162_v42 = vrot.slane %v1148_v3, %v3736_v54  ;;  %v1284_v15 = vshrl.u32 %v1196_v36, 16 }
 0x43a   : > { %v1276_v14 = vshrl.u32 %v1197_v4, 16  ;;  %v1163_v16 = vcombine.high %v1155_v41, %v3280_v38  ;;  %v1265_v21 = vpack.i.b16 %v1189_v60, %v1155_v41  ;;  %v1267_v22 = vshrl.u32 %v1155_v41, 16 }
 0x43b   : > { %v1164_v19 = vcombine.high %v1162_v42, %v3280_v38  ;;  %v1292_v24 = vshrl.u32 %v1198_v39, 16  ;;  %v1281_v46 = vpack.i.b16 %v1196_v36, %v1162_v42  ;;  %v1283_v25 = vshrl.u32 %v1162_v42, 16 }
 0x43c   : > { %v1269_v7 = vpack.i.b16 %v1268_v5, %v1267_v22  ;;  %v1273_v20 = vpack.i.b16 %v1197_v4, %v1163_v16  ;;  %v1275_v23 = vshrl.u32 %v1163_v16, 16 }
 0x43d   : > { %v1289_v12 = vpack.i.b16 %v1198_v39, %v1164_v19  ;;  %v1285_v18 = vpack.i.b16 %v1284_v15, %v1283_v25  ;;  %v1291_v61 = vshrl.u32 %v1164_v19, 16  ;;  %v1431_v27 = vcombine.low %v1265_v21, %v1281_v46 }
 0x43e   : > { %v1277_v9 = vpack.i.b16 %v1276_v14, %v1275_v23 }
 0x43f   : > { %v1439_v13 = vcombine.low %v1273_v20, %v1289_v12  ;;  %v1293_v44 = vpack.i.b16 %v1292_v24, %v1291_v61  ;;  %v1465_v45 = vcombine.low %v1269_v7, %v1285_v18  ;;  %v1438_v30 = vrot.slane %v1431_v27, %v3733_v32 }
 0x441   : > { %v1446_v8 = vrot.slane %v1439_v13, %v3733_v32  ;;  %v1472_v34 = vrot.slane %v1465_v45, %v3733_v32  ;;  %v1473_v10 = vcombine.low %v1277_v9, %v1293_v44 }
 0x443   : > { %v1447_v47 = vcombine.low %v1438_v30, %v1446_v8  ;;  %v1448_v48 = vcombine.high %v1438_v30, %v1446_v8  ;;  %v1480_v51 = vrot.slane %v1473_v10, %v3733_v32 }
 0x445   : > { %v1455_v52 = vrot.slane %v1447_v47, %v3736_v54  ;;  %v1462_v56 = vrot.slane %v1448_v48, %v3736_v54  ;;  %v1481_v55 = vcombine.low %v1472_v34, %v1480_v51  ;;  %v1482_v57 = vcombine.high %v1472_v34, %v1480_v51 }
 0x447   : > { %v1463_v43 = vcombine.high %v1455_v52, %v3280_v38  ;;  %v1464_v31 = vcombine.high %v1462_v56, %v3280_v38  ;;  %v1489_v53 = vrot.slane %v1481_v55, %v3736_v54  ;;  %v1550_v29 = vshrl.u32 %v1455_v52, 16 }
 0x448   : > { %v1496_v58 = vrot.slane %v1482_v57, %v3736_v54  ;;  %v1562_v35 = vshrl.u32 %v1462_v56, 16 }
 0x449   : > { %v1556_v40 = vshrl.u32 %v1463_v43, 16  ;;  %v1549_v59 = vpack.i.b16 %v1489_v53, %v1455_v52  ;;  %v1551_v63 = vshrl.u32 %v1489_v53, 16  ;;  %v1497_v0 = vcombine.high %v1489_v53, %v3280_v38 }
 0x44a   : > { %v1561_v1 = vpack.i.b16 %v1496_v58, %v1462_v56  ;;  %v1563_v17 = vshrl.u32 %v1496_v58, 16  ;;  %v1498_v60 = vcombine.high %v1496_v58, %v3280_v38  ;;  %v1568_v36 = vshrl.u32 %v1464_v31, 16 }
 0x44b   : > { %v2042_v2 = vsel %vm2040_vm13, %v1549_v59, 0  ;;  %v1552_v3 = vpack.i.b16 %v1551_v63, %v1550_v29  ;;  %v1555_v4 = vpack.i.b16 %v1497_v0, %v1463_v43  ;;  %v1557_v39 = vshrl.u32 %v1497_v0, 16 }
 0x44c   : > { %2987 = vmatpush3.bf16.msra.mxu0 %v2042_v2  ;;  %v2226_v5 = vsel %vm2040_vm13, %v1561_v1, 0  ;;  %v1564_v41 = vpack.i.b16 %v1563_v17, %v1562_v35  ;;  %v1567_v42 = vpack.i.b16 %v1498_v60, %v1464_v31  ;;  %v1569_v14 = vshrl.u32 %v1498_v60, 16 }
 0x44d   : > { %v2088_v15 = vsel %vm2040_vm13, %v1552_v3, 0  ;;  %2998 = vmatprep.subr.bf16.mxu0 %v3276_v28  ;;  %v2134_v16 = vsel %vm2040_vm13, %v1555_v4, 0  ;;  %v1558_v19 = vpack.i.b16 %v1557_v39, %v1556_v40 }
 0x44e   : > { %2993 = vmatpush3.bf16.msra.mxu1 %v2088_v15  ;;  %v2272_v38 = vsel %vm2040_vm13, %v1564_v41, 0  ;;  %v2318_v21 = vsel %vm2040_vm13, %v1567_v42, 0  ;;  %v1570_v22 = vpack.i.b16 %v1569_v14, %v1568_v36 }
 0x44f   : > { %3004 = vmatprep.subr.bf16.mxu1 %v3276_v28  ;;  %v2180_v24 = vsel %vm2040_vm13, %v1558_v19, 0 }
 0x450   : > { %v2364_v46 = vsel %vm2040_vm13, %v1570_v22, 0 }
 0x4a7   : > { %v1991_v25 = vpop.xlane.xlu1 %1990 }
 0x4a8   : > { %3148 = vrcp.f32 %v1991_v25 }
 0x4a9   : > { %v1994_v7 = vpop.xlane.xlu0 %1993 }
 0x4aa   : > { %3150 = vrcp.f32 %v1994_v7 }
 0x4af   : > { %v1997_v20 = vpop.xlane.xlu0 %1996 }
 0x4b0   : > { %3152 = vrcp.f32 %v1997_v20 }
 0x4b2   : > { %v3149_v23 = vpop.eup %3148 }
 0x4b3   : > { %v2021_v12 = vmul.f32 %v3149_v23, %v3867_v49  ;;  %v2000_v18 = vpop.xlane.xlu1 %1999 }
 0x4b4   : > { %v3151_v61 = vpop.eup %3150  ;;  %3154 = vrcp.f32 %v2000_v18 }
 0x4b5   : > { %v2022_v27 = vmul.f32 %v3151_v61, %v3871_v62  ;;  %v2029_v9 = vpack.c.bf16 %v2021_v12, %v2021_v12 }
 0x4b7   : > { %v2003_v13 = vpop.xlane.xlu0 %2002  ;;  %2989 = vmatmul.mubr.msk.bf16.vlgmr.msra.gmra.mrb[16].mxu0 %vm1940_vm12, %v2029_v9  ;;  %v2030_v44 = vpack.c.bf16 %v2022_v27, %v2022_v27 }
 0x4b8   : > { %3156 = vrcp.f32 %v2003_v13  ;;  %2999 = vmatpush3.bf16.msra.mxu0 %v2134_v16  ;;  %3000 = vmatprep.mubr.msk.bf16.mxu0 %vm3277_vm10, %v3276_v28 }
 0x4b9   : > { %2995 = vmatmul.mubr.msk.bf16.vlgmr.msra.gmra.mrb[16].mxu1 %vm1940_vm12, %v2030_v44  ;;  %v2006_v45 = vpop.xlane.xlu1 %2005  ;;  %3010 = vmatprep.subr.bf16.mxu0 %v3276_v28 }
 0x4ba   : > { %v3153_v49 = vpop.eup %3152  ;;  %3005 = vmatpush3.bf16.msra.mxu1 %v2180_v24  ;;  %3158 = vrcp.f32 %v2006_v45  ;;  %3006 = vmatprep.mubr.msk.bf16.mxu1 %vm3277_vm10, %v3276_v28 }
 0x4bb   : > { %v2023_v62 = vmul.f32 %v3153_v49, %v3875_v26  ;;  %3016 = vmatprep.subr.bf16.mxu1 %v3276_v28 }
 0x4bd   : > { %v2031_v30 = vpack.c.bf16 %v2023_v62, %v2023_v62 }
 0x4be   : > { %v3155_v8 = vpop.eup %3154 }
 0x4bf   : > { %v2024_v34 = vmul.f32 %v3155_v8, %v3879_v6  ;;  %v2009_v10 = vpop.xlane.xlu0 %2008  ;;  %3001 = vmatmul.mubr.msk.bf16.vlgmr.msra.gmra.mrb[20].mxu0 %vm1940_vm12, %v2031_v30 }
 0x4c0   : > { %3160 = vrcp.f32 %v2009_v10  ;;  %3011 = vmatpush3.bf16.msra.mxu0 %v2226_v5  ;;  %3012 = vmatprep.mubr.msk.bf16.mxu0 %vm3277_vm10, %v3276_v28 }
 0x4c1   : > { %v2012_v47 = vpop.xlane.xlu1 %2011  ;;  %v2032_v48 = vpack.c.bf16 %v2024_v34, %v2024_v34  ;;  %3022 = vmatprep.subr.bf16.mxu0 %v3276_v28 }
 0x4c2   : > { %v3157_v51 = vpop.eup %3156  ;;  %3162 = vrcp.f32 %v2012_v47 }
 0x4c3   : > { %v2025_v26 = vmul.f32 %v3157_v51, %v3883_v33  ;;  %3007 = vmatmul.mubr.msk.bf16.vlgmr.msra.gmra.mrb[20].mxu1 %vm1940_vm12, %v2032_v48 }
 0x4c4   : > { %v3159_v52 = vpop.eup %3158  ;;  %3017 = vmatpush3.bf16.msra.mxu1 %v2272_v38  ;;  %3018 = vmatprep.mubr.msk.bf16.mxu1 %vm3277_vm10, %v3276_v28 }
 0x4c5   : > { %v2026_v6 = vmul.f32 %v3159_v52, %v3887_v50  ;;  %v2033_v56 = vpack.c.bf16 %v2025_v26, %v2025_v26  ;;  %3028 = vmatprep.subr.bf16.mxu1 %v3276_v28 }
 0x4c7   : > { %3013 = vmatmul.mubr.msk.bf16.vlgmr.msra.gmra.mrb[24].mxu0 %vm1940_vm12, %v2033_v56  ;;  %v2034_v55 = vpack.c.bf16 %v2026_v6, %v2026_v6 }
 0x4c8   : > { %3023 = vmatpush3.bf16.msra.mxu0 %v2318_v21  ;;  %3024 = vmatprep.mubr.msk.bf16.mxu0 %vm3277_vm10, %v3276_v28 }
 0x4ca   : > { %v3161_v33 = vpop.eup %3160 }
 0x4cb   : > { %v2027_v57 = vmul.f32 %v3161_v33, %v3892_v11  ;;  %3019 = vmatmul.mubr.msk.bf16.vlgmr.msra.gmra.mrb[24].mxu1 %vm1940_vm12, %v2034_v55 }
 0x4cc   : > { %v3163_v43 = vpop.eup %3162  ;;  %3029 = vmatpush3.bf16.msra.mxu1 %v2364_v46  ;;  %3030 = vmatprep.mubr.msk.bf16.mxu1 %vm3277_vm10, %v3276_v28 }
 0x4cd   : > { %v2028_v50 = vmul.f32 %v3163_v43, %v3897_v37  ;;  %v2035_v31 = vpack.c.bf16 %v2027_v57, %v2027_v57 }
 0x4cf   : > { %3025 = vmatmul.mubr.msk.bf16.vlgmr.msra.gmra.mrb[28].mxu0 %vm1940_vm12, %v2035_v31  ;;  %v2036_v53 = vpack.c.bf16 %v2028_v50, %v2028_v50 }
 0x4d3   : > { %3031 = vmatmul.mubr.msk.bf16.vlgmr.msra.gmra.mrb[28].mxu1 %vm1940_vm12, %v2036_v53 }
 0x58a   : > { %v2078_v29 = vpop.f32.mrb[16].mxu0 }
 0x58b   : > { %v2990_v58 = vpop.f32.mrb[17].mxu0 }
 0x58c   : > { %v2081_v40 = vpop.f32.mrb[18].mxu0  ;;  %v2124_v35 = vpop.f32.mrb[16].mxu1 }
 0x58d   : > { %v2991_v11 = vpop.f32.mrb[19].mxu0  ;;  %v2996_v59 = vpop.f32.mrb[17].mxu1 }
 0x58e   : > { %v2127_v63 = vpop.f32.mrb[18].mxu1 }
 0x58f   : > { %v2997_v0 = vpop.f32.mrb[19].mxu1 }
 0x592   : > { %v2170_v1 = vpop.f32.mrb[20].mxu0 }
 0x593   : > { %v2406_v17 = vcombine.low %v2078_v29, %v2170_v1  ;;  %v2407_v60 = vcombine.high %v2078_v29, %v2170_v1  ;;  %v3002_v28 = vpop.f32.mrb[21].mxu0 }
 0x594   : > { %v2173_v36 = vpop.f32.mrb[22].mxu0 }
 0x595   : > { %v3003_v37 = vpop.f32.mrb[23].mxu0  ;;  %v2414_v41 = vrot.slane %v2406_v17, %v3733_v32  ;;  %v2421_v42 = vrot.slane %v2407_v60, %v3733_v32 }
 0x596   : > { %v2216_v2 = vpop.f32.mrb[20].mxu1 }
 0x597   : > { %v2422_v3 = vcombine.low %v2124_v35, %v2216_v2  ;;  %v2423_v4 = vcombine.high %v2124_v35, %v2216_v2  ;;  %v3008_v39 = vpop.f32.mrb[21].mxu1 }
 0x598   : > { %v2219_v5 = vpop.f32.mrb[22].mxu1 }
 0x599   : > { %v2430_v14 = vrot.slane %v2422_v3, %v3733_v32  ;;  %v2437_v15 = vrot.slane %v2423_v4, %v3733_v32  ;;  %v3009_v16 = vpop.f32.mrb[23].mxu1 }
 0x59a   : > { %v2262_v19 = vpop.f32.mrb[24].mxu0 }
 0x59b   : > { %v2470_v38 = vcombine.low %v2414_v41, %v2430_v14  ;;  %v2471_v21 = vcombine.high %v2414_v41, %v2430_v14  ;;  %v2486_v22 = vcombine.low %v2421_v42, %v2437_v15  ;;  %v2487_v24 = vcombine.high %v2421_v42, %v2437_v15  ;;  %v3014_v46 = vpop.f32.mrb[25].mxu0 }
 0x59c   : > { %v2265_v25 = vpop.f32.mrb[26].mxu0 }
 0x59d   : > { %v2478_v7 = vrot.slane %v2470_v38, %v3736_v54  ;;  %v2485_v20 = vrot.slane %v2471_v21, %v3736_v54  ;;  %v2494_v23 = vrot.slane %v2486_v22, %v3736_v54  ;;  %v2501_v12 = vrot.slane %v2487_v24, %v3736_v54  ;;  %v3015_v18 = vpop.f32.mrb[27].mxu0 }
 0x59e   : > { %v2308_v61 = vpop.f32.mrb[24].mxu1 }
 0x59f   : > { %v2888_v27 = vcombine.low %v2478_v7, %v2485_v20  ;;  %v2890_v9 = vcombine.high %v2478_v7, %v2485_v20  ;;  %v2892_v13 = vcombine.low %v2494_v23, %v2501_v12  ;;  %v2894_v44 = vcombine.high %v2494_v23, %v2501_v12  ;;  %v3020_v45 = vpop.f32.mrb[25].mxu1 }
 0x5a0   : > { %v2311_v49 = vpop.f32.mrb[26].mxu1 }
 0x5a1   : > { %v3021_v62 = vpop.f32.mrb[27].mxu1  ;;  %v2550_v30 = vrot.slane %v2888_v27, %v3733_v32  ;;  %v2566_v8 = vrot.slane %v2890_v9, %v3733_v32  ;;  %v2582_v34 = vrot.slane %v2892_v13, %v3733_v32  ;;  %v2598_v10 = vrot.slane %v2894_v44, %v3733_v32 }
 0x5a2   : > { %v2354_v47 = vpop.f32.mrb[28].mxu0 }
 0x5a3   : > { %v2438_v48 = vcombine.low %v2262_v19, %v2354_v47  ;;  %v2439_v51 = vcombine.high %v2262_v19, %v2354_v47  ;;  %v3026_v26 = vpop.f32.mrb[29].mxu0  ;;  %v2607_v52 = vcombine.high %v2550_v30, %v2566_v8  ;;  %v2639_v6 = vcombine.high %v2582_v34, %v2598_v10 }
 0x5a4   : > { %v2357_v56 = vpop.f32.mrb[30].mxu0  ;;  %v2606_v55 = vcombine.low %v2550_v30, %v2566_v8  ;;  %v2638_v33 = vcombine.low %v2582_v34, %v2598_v10 }
 0x5a5   : > { %v3027_v57 = vpop.f32.mrb[31].mxu0  ;;  %v2621_v43 = vrot.slane %v2607_v52, %v3736_v54  ;;  %v2653_v50 = vrot.slane %v2639_v6, %v3736_v54  ;;  %v2446_v17 = vrot.slane %v2438_v48, %v3733_v32  ;;  %v2453_v60 = vrot.slane %v2439_v51, %v3733_v32 }
 0x5a6   : > { %v2400_v31 = vpop.f32.mrb[28].mxu1  ;;  %v2614_v53 = vrot.slane %v2606_v55, %v3736_v54  ;;  %v2646_v29 = vrot.slane %v2638_v33, %v3736_v54 }
 0x5a7   : > { %v2454_v58 = vcombine.low %v2308_v61, %v2400_v31  ;;  %v2455_v40 = vcombine.high %v2308_v61, %v2400_v31  ;;  %v3032_v35 = vpop.f32.mrb[29].mxu1  ;;  %v2672_v11 = vcombine.low %v2621_v43, %v2653_v50  ;;  %v2673_v59 = vcombine.high %v2621_v43, %v2653_v50 }
 0x5a8   : > { %v2403_v63 = vpop.f32.mrb[30].mxu1  ;;  %v2671_v0 = vcombine.high %v2614_v53, %v2646_v29  ;;  %v2670_v1 = vcombine.low %v2614_v53, %v2646_v29 }
 0x5a9   : > { %v2462_v28 = vrot.slane %v2454_v58, %v3733_v32  ;;  %v2469_v36 = vrot.slane %v2455_v40, %v3733_v32  ;;  %v3033_v37 = vpop.f32.mrb[31].mxu1  ;;  %2683 = vrot.lane.b32.xlu1 %v2672_v11, %s3273_s18 }
 0x5aa   : > { %2679 = vrot.lane.b32.xlu0 %v2671_v0, %s3275_s13 }
 0x5ab   : > { %v2502_v2 = vcombine.low %v2446_v17, %v2462_v28  ;;  %v2503_v3 = vcombine.high %v2446_v17, %v2462_v28  ;;  %v2518_v4 = vcombine.low %v2453_v60, %v2469_v36  ;;  %v2519_v39 = vcombine.high %v2453_v60, %v2469_v36 }
 0x5ad   : > { %v2510_v5 = vrot.slane %v2502_v2, %v3736_v54  ;;  %v2517_v41 = vrot.slane %v2503_v3, %v3736_v54  ;;  %v2526_v42 = vrot.slane %v2518_v4, %v3736_v54  ;;  %v2533_v14 = vrot.slane %v2519_v39, %v3736_v54  ;;  %2687 = vrot.lane.b32.xlu1 %v2673_v59, %s3274_s20 }
 0x5af   : > { %v2889_v15 = vcombine.low %v2510_v5, %v2517_v41  ;;  %v2891_v16 = vcombine.high %v2510_v5, %v2517_v41  ;;  %v2893_v19 = vcombine.low %v2526_v42, %v2533_v14  ;;  %v2895_v38 = vcombine.high %v2526_v42, %v2533_v14 }
 0x5b1   : > { %v2557_v21 = vrot.slane %v2889_v15, %v3733_v32  ;;  %v2573_v22 = vrot.slane %v2891_v16, %v3733_v32  ;;  %v2589_v24 = vrot.slane %v2893_v19, %v3733_v32  ;;  %v2605_v46 = vrot.slane %v2895_v38, %v3733_v32 }
 0x5b3   : > { %v2622_v25 = vcombine.low %v2557_v21, %v2573_v22  ;;  %v2654_v7 = vcombine.low %v2589_v24, %v2605_v46  ;;  %v2623_v20 = vcombine.high %v2557_v21, %v2573_v22  ;;  %v2655_v23 = vcombine.high %v2589_v24, %v2605_v46 }
 0x5b5   : > { %v2630_v12 = vrot.slane %v2622_v25, %v3736_v54  ;;  %v2662_v18 = vrot.slane %v2654_v7, %v3736_v54  ;;  %v2637_v61 = vrot.slane %v2623_v20, %v3736_v54  ;;  %v2669_v27 = vrot.slane %v2655_v23, %v3736_v54 }
 0x5b7   : > { %v2675_v9 = vcombine.high %v2630_v12, %v2662_v18  ;;  %v2674_v13 = vcombine.low %v2630_v12, %v2662_v18  ;;  %v2677_v44 = vcombine.high %v2637_v61, %v2669_v27  ;;  %v2676_v45 = vcombine.low %v2637_v61, %v2669_v27 }
 0x5b9   : > { %2695 = vrot.lane.b32.xlu1 %v2675_v9, %s3269_s8  ;;  %2691 = vrot.lane.b32.xlu0 %v2674_v13, %s3271_s9  ;;  %s4086_s8 = sand.u32 1, %s3234_s22   ;;  %s3164_s9 = scalar_lea.vmem %s4015_s7, 128 }
 0x5ba   : > { %p3165_p0 = scmp.ne.s32.totalorder %s4015_s7, %s3164_s9 }
 0x5bc   : > { %p3166_p1 = pnand %p3165_p0, %p3368_p3 }
 0x5bd   : > { %2703 = vrot.lane.b32.xlu1 %v2677_v44, %s3270_s16  ;;  %2699 = vrot.lane.b32.xlu0 %v2676_v45, %s3272_s12  ;;  %s2721_s16 = scalar_lea.sflag [#allocation4], %s4086_s8  ;;  %s3281_s12 = smov [#allocation3]  }
 0x5be   : > { %p3167_p2 = pneg %p3166_p1  ;;  %s3168_s18 = sshll.u32 %s3281_s12, 4  ;;  %s3169_s18 = int_to_ptr.vmem [resolvable:$false] %s3168_s18 }
 0x5bf   : > { %s3170_s20 = scalar_lea.vmem %s3169_s18, 256  ;;  %p3171_p4 = scmp.lt.s32.totalorder %s4015_s7, %s3169_s18 }
 0x5c0   : > { %p3172_p5 = scmp.lt.s32.totalorder %s3170_s20, %s3164_s9 }
 0x5c2   : > { %p3173_p6 = por %p3172_p5, %p3171_p4 }
 0x5c4   : > { %p3174_p7 = pnand %p3173_p6, %p3167_p2 }
 0x61b   : > { %v2684_v32 = vpop.permute.xlu1 %2683 }
 0x61c   : > { %v2680_v49 = vpop.permute.xlu0 %2679 }
 0x61d   : > { %v2706_v62 = vsel %vm1571_vm11, %v2670_v1, %v2680_v49 }
 0x61e   : > { %v2708_v30 = vsel %vm2707_vm14, %v2706_v62, %v2684_v32 }
 0x61f   : > { %v2688_v54 = vpop.permute.xlu1 %2687 }
 0x620   : > { %v2710_v8 = vsel %vm2709_vm15, %v2708_v30, %v2688_v54 }
 0x62b   : > { %v2696_v34 = vpop.permute.xlu1 %2695  ;;  %v2692_v10 = vpop.permute.xlu0 %2691 }
 0x62c   : > { %v2712_v47 = vsel %vm2711_vm0, %v2710_v8, %v2692_v10 }
 0x62d   : > { %v2714_v51 = vsel %vm2713_vm1, %v2712_v47, %v2696_v34 }
 0x62f   : > { %v2704_v48 = vpop.permute.xlu1 %2703  ;;  %v2700_v26 = vpop.permute.xlu0 %2699 }
 0x630   : > { %v2716_v52 = vsel %vm2715_vm2, %v2714_v51, %v2700_v26 }
 0x631   : > { %v2718_v6 = vsel %vm2717_vm3, %v2716_v52, %v2704_v48 }
 0x632   : > { %2719 = vst [vmem:[%s273_s14] sm:$0xff] %v2718_v6 }
 0x633   : > { %3177 = shalt.err (!%p3174_p7)
}
 0x634   : > { %s3178_s17 = scalar_lea.hbm %s4013_s24, 128  ;;  %s3182_s19 = scalar_lea.hbm %s4076_s6, 512 }
 0x635   : > { %p3179_p9 = scmp.ne.s32.totalorder %s4013_s24, %s3178_s17  ;;  %p3183_p12 = scmp.lt.u32.totalorder %s4013_s24, %s4076_s6 }
 0x636   : > { %p3184_p13 = scmp.lt.u32.totalorder %s3182_s19, %s3178_s17  ;;  %p3186_p1 = scmp.lt.u32.totalorder %s3178_s17, %s4013_s24 }
 0x637   : > { %p3180_p10 = pnand %p3179_p9, %p3368_p3 }
 0x638   : > { %p3185_p0 = por %p3184_p13, %p3183_p12 }
 0x639   : > { %p3181_p11 = pneg %p3180_p10 }
 0x63a   : > { %p3187_p2 = por %p3186_p1, %p3185_p0 }
 0x63c   : > { %p3188_p4 = pnand %p3187_p2, %p3181_p11 }
 0x63e   : > { %3191 = shalt.err (!%p3188_p4)
}
 0x63f   : > { %3038 = dma.vmem_to_hbm [thread:$0]  (%p3368_p3), %s4015_s7, 128, %s4013_s24, %s2721_s16  }
 0x640 PF: > { %p3044_p5 = scmp.ge.s32.totalorder %s3258_s28, 2  ;;  %s2748_s25 = sand.u32 1, %s3230_s21  }
 0x641   : > { %s2749_s27 = scalar_lea.sflag [#allocation4], %s2748_s25 }
 0x642   : > { %p3041_p6 = pnand %p3044_p5, %p3377_p8 }
 0x644   : > { %3225 = dma.done.wait (!%p3041_p6), %s2749_s27, 128  }
 0x645   : > { %3227 = vsyncadd (!%p3041_p6), %s2749_s27, 4294967168  ;;  %s19_s28 = sadd.s32 1, %s3258_s28   ;;  %s4087_s25 = sld [smem:[#allocation6_spill]] }
 0x646   : > { %p16_p7 = scmp.ge.s32.totalorder %s19_s28, 6   ;;  %s4088_s10 = sld [smem:[#allocation7_spill]] }
 0x647   : > { %s4089_s27 = sld [smem:[#allocation8_spill]]  ;;  %s4090_s21 = smov %s3234_s22 }
 0x648   : > { %s4091_s22 = smov %s3238_s23  ;;  %s4092_s23 = smov %s3386_s15 }
 0x649   : > { %s4093_s24 = smov %s3250_s26  ;;  %18 = sbr.rel (!%p16_p7) target bundleno = 5 (0x5), region = 102 }
 0x64c   : > { %s4094_s26 = smov %s4088_s10 }
 0x650   :  { %2754 = vsyncpa [#allocation4], 1 }
 0x651   :  { %2756 = vsyncpa [#allocation4 + $0x1], 1 }

</bundles_post_ra>
